<compile_context>
chip_gen: v6e
topology: v6e:2x2x1
jax: 0.10.0
libtpu: 0.0.40
codegen_flags: <defaults>
</compile_context>

<pallas_src>
import jax
import jax.numpy as jnp
from jax.experimental import pallas as pl
from jax.experimental.pallas import tpu as pltpu


def _ceil8(n):
    return (n + 7) // 8 * 8


def _packed_offsets(H, C):
    """Row offsets of each parameter block inside the packed (rows, 4H) buffer.

    Every block starts on an 8-row boundary so the in-kernel static slices never
    straddle an unaligned sublane offset.
    """
    o_wih = 0                        # (C, 4H)  LSTM input->gates weight, transposed
    o_whh = o_wih + _ceil8(C)        # (H, 4H)  LSTM hidden->gates weight, transposed
    o_wcls = o_whh + _ceil8(H)       # (H, C)   classifier weight, transposed (cols 0:C)
    o_bias = o_wcls + _ceil8(H)      # (1, 4H)  b_ih + b_hh
    o_bcls = o_bias + 8              # (1, C)   classifier bias (cols 0:C)
    rows = o_bcls + 8
    return o_wih, o_whh, o_wcls, o_bias, o_bcls, rows


def _seq_gen_kernel(noise_ref, params_ref, gumbel_ref, out_ref):
    B, H = noise_ref.shape
    T, _, C = gumbel_ref.shape
    o_wih, o_whh, o_wcls, o_bias, o_bcls, _ = _packed_offsets(H, C)

    # ---- prologue: every loop-invariant load / broadcast happens exactly once ----
    packed = params_ref[...]                                   # one DMA'd parameter buffer
    w_ih = packed[o_wih:o_wih + C, :]                          # (C, 4H)
    w_hh = packed[o_whh:o_whh + H, :]                          # (H, 4H)
    w_cls = packed[o_wcls:o_wcls + H, 0:C]                     # (H, C)
    bias = jnp.broadcast_to(packed[o_bias:o_bias + 1, :], (B, 4 * H))   # (B, 4H)
    b_cls = jnp.broadcast_to(packed[o_bcls:o_bcls + 1, 0:C], (B, C))    # (B, C)
    lane = jax.lax.broadcasted_iota(jnp.int32, (B, C), 1)      # loop-invariant lane index
    g_all = gumbel_ref[...]                                    # (T, B, C) hoisted: 1 load total

    # ---- recurrence state ----
    h = noise_ref[...]                                         # h = noise[None] in PyTorch
    c = jnp.zeros((B, H), jnp.float32)                         # c = zeros_like(h)
    s = jnp.zeros((B, C), jnp.float32)                         # samples = zeros(B, C)

    # Fully unrolled recurrence: T is small and static, so stores / one-hot work can be
    # overlapped with the next step's MXU pushes by the scheduler.
    for t in range(T):
        # LSTM cell (PyTorch gate order: i, f, g, o)
        gates = (jnp.dot(s, w_ih, preferred_element_type=jnp.float32)
                 + jnp.dot(h, w_hh, preferred_element_type=jnp.float32)
                 + bias)                                       # (B, 4H) == one 128-lane vreg

        # 2 EUP pushes on the full gates vreg instead of 4 per-quarter pushes.
        sig = jax.nn.sigmoid(gates)
        tah = jnp.tanh(gates)
        # Static lane-quarter extracts; lane realignment is inherent to the gate layout and
        # lands in the XLU/relayout path (verified to compile & run; see review note).
        i_g = sig[:, 0 * H:1 * H]
        f_g = sig[:, 1 * H:2 * H]
        g_g = tah[:, 2 * H:3 * H]
        o_g = sig[:, 3 * H:4 * H]

        c = f_g * c + i_g * g_g
        h = o_g * jnp.tanh(c)

        # classifier
        logits = jnp.dot(h, w_cls, preferred_element_type=jnp.float32) + b_cls   # (B, C)

        # Full (B, C) tile store at a static leading index (time-major output layout);
        # not on the recurrence critical path.
        out_ref[t] = logits

        # Hard gumbel-softmax feedback: one-hot(argmax(logits + g)).
        # (/tau dropped: positive scaling does not change the argmax; forward hard path only.)
        y = logits + g_all[t]
        max_val = jnp.max(y, axis=-1, keepdims=True)
        # Exact first-index tie-break (matches torch). NOTE: the fill value C assumes the
        # lane iota covers exactly C valid lanes; if C is ever padded for lane density the
        # padded lanes must be masked here.
        first_idx = jnp.min(jnp.where(y >= max_val, lane, C), axis=-1, keepdims=True)
        s = (lane == first_idx).astype(jnp.float32)            # (B, C) one-hot


def pack_params(w_ih, w_hh, b_ih, b_hh, w_cls, b_cls):
    """Pack the (PyTorch-layout) parameters into one (rows, 4H) f32 buffer so the
    kernel needs a single parameter DMA."""
    fourH, C = w_ih.shape
    H = fourH // 4
    o_wih, o_whh, o_wcls, o_bias, o_bcls, rows = _packed_offsets(H, C)
    buf = jnp.zeros((rows, 4 * H), jnp.float32)
    buf = buf.at[o_wih:o_wih + C, :].set(w_ih.T)           # (C, 4H)
    buf = buf.at[o_whh:o_whh + H, :].set(w_hh.T)           # (H, 4H)
    buf = buf.at[o_wcls:o_wcls + H, 0:C].set(w_cls.T)      # (H, C)
    buf = buf.at[o_bias, :].set(b_ih + b_hh)               # (4H,)
    buf = buf.at[o_bcls, 0:C].set(b_cls)                   # (C,)
    return buf


def init_params(key, inp_dim, num_classes):
    """Deterministic synthetic parameters (PyTorch-style uniform init), pre-packed."""
    H, C = inp_dim, num_classes
    k = 1.0 / jnp.sqrt(jnp.float32(H))
    ks = jax.random.split(key, 6)
    w_ih = jax.random.uniform(ks[0], (4 * H, C), jnp.float32, -k, k)
    w_hh = jax.random.uniform(ks[1], (4 * H, H), jnp.float32, -k, k)
    b_ih = jax.random.uniform(ks[2], (4 * H,), jnp.float32, -k, k)
    b_hh = jax.random.uniform(ks[3], (4 * H,), jnp.float32, -k, k)
    w_cls = jax.random.uniform(ks[4], (C, H), jnp.float32, -k, k)
    b_cls = jax.random.uniform(ks[5], (C,), jnp.float32, -k, k)
    return pack_params(w_ih, w_hh, b_ih, b_hh, w_cls, b_cls)


def sequence_generator_forward(noise, packed_params, gumbel, *, tau=2.0, batch_block=None):
    """Full SequenceGenerator forward pass. Returns logits of shape (B, T, C).

    tau only affects the soft / gradient path of F.gumbel_softmax; the forward hard
    one-hot (and hence the returned logits) is invariant to it.
    batch_block: optional batch chunk (multiple of 8) to shard large batches across
    TensorCores via a parallel grid; at B=2 the grid is trivially (1,).
    """
    del tau  # TODO(synk): soft / straight-through gradient path of gumbel_softmax not implemented.
    B, H = noise.shape
    T, _, C = gumbel.shape
    bb = B if batch_block is None else batch_block
    assert B % bb == 0 and (bb == B or bb % 8 == 0), "batch_block must divide B (multiple of 8 if < B)"

    out_tbc = pl.pallas_call(
        _seq_gen_kernel,
        out_shape=jax.ShapeDtypeStruct((T, B, C), jnp.float32),
        grid_spec=pltpu.PrefetchScalarGridSpec(
            num_scalar_prefetch=0,
            grid=(B // bb,),
            in_specs=[
                pl.BlockSpec((bb, H), lambda i: (i, 0)),                 # noise
                pl.BlockSpec(packed_params.shape, lambda i: (0, 0)),     # packed params (1 DMA)
                pl.BlockSpec((T, bb, C), lambda i: (0, i, 0)),           # gumbel noise
            ],
            out_specs=pl.BlockSpec((T, bb, C), lambda i: (0, i, 0)),
        ),
        compiler_params=pltpu.CompilerParams(
            dimension_semantics=("parallel",)),   # shards batch chunks across TCs on v7x
    )(noise, packed_params, gumbel)

    # Tiny (T,B,C) -> (B,T,C) transpose outside the kernel (matches torch.cat(..., dim=1)).
    return jnp.transpose(out_tbc, (1, 0, 2))


if __name__ == "__main__":
    # Shapes consistent with the module: batch=2, inp_dim(hidden)=32, num_classes=8,
    # seq_length=8, tau=2.  (For throughput, pack more independent sequences into the
    # batch dim — the kernel/grid are shape-generic.)
    B, H, C, T = 2, 32, 8, 8
    TAU = 2.0

    root = jax.random.PRNGKey(0)
    k_noise, k_params, k_gumbel = jax.random.split(root, 3)

    noise = jax.random.normal(k_noise, (B, H), jnp.float32)
    packed_params = init_params(k_params, H, C)

    # Gumbel(0,1) noise for F.gumbel_softmax, precomputed per step (glue, not hot path).
    u = jax.random.uniform(k_gumbel, (T, B, C), jnp.float32, minval=1e-10, maxval=1.0)
    gumbel = -jnp.log(-jnp.log(u))

    logits = sequence_generator_forward(noise, packed_params, gumbel, tau=TAU)
    jax.block_until_ready(logits)

    assert logits.shape == (B, T, C), logits.shape
    assert bool(jnp.all(jnp.isfinite(logits)))
    print("KERNEL_OK")
</pallas_src>

<mosaic_0001>
module attributes {stable_mosaic.version = 11 : i64} {
  func.func @_seq_gen_kernel(%arg0: i32, %arg1: memref<2x32xf32, #tpu.memory_space<vmem>>, %arg2: memref<88x128xf32, #tpu.memory_space<vmem>>, %arg3: memref<8x2x8xf32, #tpu.memory_space<vmem>>, %arg4: memref<8x2x8xf32, #tpu.memory_space<vmem>>) attributes {dimension_semantics = [#tpu.dimension_semantics<parallel>], iteration_bounds = array<i64: 1>, scalar_prefetch = 0 : i64, scratch_operands = 0 : i64, tpu.core_type = #tpu.core_type<tc>, window_params = [{transform_indices = @transform_0, window_bounds = array<i64: 2, 32>}, {pipeline_mode = #tpu.pipeline_mode<synchronous>, transform_indices = @transform_1, window_bounds = array<i64: 88, 128>}, {transform_indices = @transform_2, window_bounds = array<i64: 8, 2, 8>}, {transform_indices = @transform_3, window_bounds = array<i64: 8, 2, 8>}]} {
    %c0 = arith.constant 0 : index
    %c0_0 = arith.constant 0 : index
    %0 = vector.load %arg2[%c0, %c0_0] : memref<88x128xf32, #tpu.memory_space<vmem>>, vector<88x128xf32>
    %1 = vector.extract_strided_slice %0 {offsets = [0, 0], sizes = [8, 128], strides = [1, 1]} : vector<88x128xf32> to vector<8x128xf32>
    %2 = vector.extract_strided_slice %0 {offsets = [8, 0], sizes = [32, 128], strides = [1, 1]} : vector<88x128xf32> to vector<32x128xf32>
    %3 = vector.extract_strided_slice %0 {offsets = [40, 0], sizes = [32, 8], strides = [1, 1]} : vector<88x128xf32> to vector<32x8xf32>
    %4 = vector.extract_strided_slice %0 {offsets = [72, 0], sizes = [1, 128], strides = [1, 1]} : vector<88x128xf32> to vector<1x128xf32>
    %5 = vector.shape_cast %4 : vector<1x128xf32> to vector<1x128xf32>
    %6 = vector.broadcast %5 : vector<1x128xf32> to vector<2x128xf32>
    %7 = vector.extract_strided_slice %0 {offsets = [80, 0], sizes = [1, 8], strides = [1, 1]} : vector<88x128xf32> to vector<1x8xf32>
    %8 = vector.shape_cast %7 : vector<1x8xf32> to vector<1x8xf32>
    %9 = vector.broadcast %8 : vector<1x8xf32> to vector<2x8xf32>
    %10 = tpu.iota {dimensions = array<i32: 1>} : vector<2x8xi32>
    %c0_1 = arith.constant 0 : index
    %c0_2 = arith.constant 0 : index
    %c0_3 = arith.constant 0 : index
    %11 = vector.load %arg3[%c0_1, %c0_2, %c0_3] : memref<8x2x8xf32, #tpu.memory_space<vmem>>, vector<8x2x8xf32>
    %c0_4 = arith.constant 0 : index
    %c0_5 = arith.constant 0 : index
    %12 = vector.load %arg1[%c0_4, %c0_5] : memref<2x32xf32, #tpu.memory_space<vmem>>, vector<2x32xf32>
    %cst = arith.constant 0.000000e+00 : f32
    %13 = vector.broadcast %cst : f32 to vector<2x32xf32>
    %cst_6 = arith.constant 0.000000e+00 : f32
    %14 = vector.broadcast %cst_6 : f32 to vector<2x8xf32>
    %cst_7 = arith.constant dense<0.000000e+00> : vector<2x128xf32>
    %15 = tpu.matmul %14, %1, %cst_7 {dimension_numbers = #tpu.dot_dimension_numbers<[1], [0], [0], [1], [0, 0, 1, 1], [], []>} : vector<2x8xf32>, vector<8x128xf32>, vector<2x128xf32> -> vector<2x128xf32>
    %cst_8 = arith.constant dense<0.000000e+00> : vector<2x128xf32>
    %16 = tpu.matmul %12, %2, %cst_8 {dimension_numbers = #tpu.dot_dimension_numbers<[1], [0], [0], [1], [0, 0, 1, 1], [], []>} : vector<2x32xf32>, vector<32x128xf32>, vector<2x128xf32> -> vector<2x128xf32>
    %17 = arith.addf %15, %16 : vector<2x128xf32>
    %18 = arith.addf %17, %6 : vector<2x128xf32>
    %19 = arith.negf %18 : vector<2x128xf32>
    %20 = math.exp %19 : vector<2x128xf32>
    %cst_9 = arith.constant 1.000000e+00 : f32
    %21 = vector.broadcast %cst_9 : f32 to vector<2x128xf32>
    %22 = arith.addf %21, %20 : vector<2x128xf32>
    %23 = arith.divf %21, %22 : vector<2x128xf32>
    %24 = math.tanh %18 : vector<2x128xf32>
    %25 = vector.extract_strided_slice %23 {offsets = [0, 0], sizes = [2, 32], strides = [1, 1]} : vector<2x128xf32> to vector<2x32xf32>
    %26 = vector.extract_strided_slice %23 {offsets = [0, 32], sizes = [2, 32], strides = [1, 1]} : vector<2x128xf32> to vector<2x32xf32>
    %27 = vector.extract_strided_slice %24 {offsets = [0, 64], sizes = [2, 32], strides = [1, 1]} : vector<2x128xf32> to vector<2x32xf32>
    %28 = vector.extract_strided_slice %23 {offsets = [0, 96], sizes = [2, 32], strides = [1, 1]} : vector<2x128xf32> to vector<2x32xf32>
    %29 = arith.mulf %26, %13 : vector<2x32xf32>
    %30 = arith.mulf %25, %27 : vector<2x32xf32>
    %31 = arith.addf %29, %30 : vector<2x32xf32>
    %32 = math.tanh %31 : vector<2x32xf32>
    %33 = arith.mulf %28, %32 : vector<2x32xf32>
    %cst_10 = arith.constant dense<0.000000e+00> : vector<2x8xf32>
    %34 = tpu.matmul %33, %3, %cst_10 {dimension_numbers = #tpu.dot_dimension_numbers<[1], [0], [0], [1], [0, 0, 1, 1], [], []>} : vector<2x32xf32>, vector<32x8xf32>, vector<2x8xf32> -> vector<2x8xf32>
    %35 = arith.addf %34, %9 : vector<2x8xf32>
    %c0_11 = arith.constant 0 : index
    %c0_12 = arith.constant 0 : index
    %c0_13 = arith.constant 0 : index
    %36 = vector.load %arg4[%c0_11, %c0_12, %c0_13] : memref<8x2x8xf32, #tpu.memory_space<vmem>>, vector<1x2x8xf32>
    %37 = vector.shape_cast %36 : vector<1x2x8xf32> to vector<2x8xf32>
    %38 = vector.shape_cast %35 : vector<2x8xf32> to vector<1x2x8xf32>
    tpu.vector_store %arg4[%c0_11, %c0_12, %c0_13], %38 {strides = array<i32>} : memref<8x2x8xf32, #tpu.memory_space<vmem>>, vector<1x2x8xf32>,
    %39 = vector.extract_strided_slice %11 {offsets = [0, 0, 0], sizes = [1, 2, 8], strides = [1, 1, 1]} : vector<8x2x8xf32> to vector<1x2x8xf32>
    %40 = vector.shape_cast %39 : vector<1x2x8xf32> to vector<2x8xf32>
    %41 = arith.addf %35, %40 : vector<2x8xf32>
    %cst_14 = arith.constant dense<0xFF800000> : vector<2xf32>
    %42 = vector.multi_reduction <maximumf>, %41, %cst_14 [1] : vector<2x8xf32> to vector<2xf32>
    %43 = vector.shape_cast %42 : vector<2xf32> to vector<2x1xf32>
    %44 = vector.broadcast %43 : vector<2x1xf32> to vector<2x8xf32>
    %45 = arith.cmpf oge, %41, %44 : vector<2x8xf32>
    %c8_i32 = arith.constant 8 : i32
    %46 = vector.broadcast %c8_i32 : i32 to vector<2x8xi32>
    %47 = arith.select %45, %10, %46 : vector<2x8xi1>, vector<2x8xi32>
    %cst_15 = arith.constant dense<2147483647> : vector<2xi32>
    %48 = vector.multi_reduction <minsi>, %47, %cst_15 [1] : vector<2x8xi32> to vector<2xi32>
    %49 = vector.shape_cast %48 : vector<2xi32> to vector<2x1xi32>
    %50 = vector.broadcast %49 : vector<2x1xi32> to vector<2x8xi32>
    %51 = arith.cmpi eq, %10, %50 : vector<2x8xi32>
    %52 = arith.extui %51 : vector<2x8xi1> to vector<2x8xi32>
    %53 = arith.sitofp %52 : vector<2x8xi32> to vector<2x8xf32>
    %cst_16 = arith.constant dense<0.000000e+00> : vector<2x128xf32>
    %54 = tpu.matmul %53, %1, %cst_16 {dimension_numbers = #tpu.dot_dimension_numbers<[1], [0], [0], [1], [0, 0, 1, 1], [], []>} : vector<2x8xf32>, vector<8x128xf32>, vector<2x128xf32> -> vector<2x128xf32>
    %cst_17 = arith.constant dense<0.000000e+00> : vector<2x128xf32>
    %55 = tpu.matmul %33, %2, %cst_17 {dimension_numbers = #tpu.dot_dimension_numbers<[1], [0], [0], [1], [0, 0, 1, 1], [], []>} : vector<2x32xf32>, vector<32x128xf32>, vector<2x128xf32> -> vector<2x128xf32>
    %56 = arith.addf %54, %55 : vector<2x128xf32>
    %57 = arith.addf %56, %6 : vector<2x128xf32>
    %58 = arith.negf %57 : vector<2x128xf32>
    %59 = math.exp %58 : vector<2x128xf32>
    %cst_18 = arith.constant 1.000000e+00 : f32
    %60 = vector.broadcast %cst_18 : f32 to vector<2x128xf32>
    %61 = arith.addf %60, %59 : vector<2x128xf32>
    %62 = arith.divf %60, %61 : vector<2x128xf32>
    %63 = math.tanh %57 : vector<2x128xf32>
    %64 = vector.extract_strided_slice %62 {offsets = [0, 0], sizes = [2, 32], strides = [1, 1]} : vector<2x128xf32> to vector<2x32xf32>
    %65 = vector.extract_strided_slice %62 {offsets = [0, 32], sizes = [2, 32], strides = [1, 1]} : vector<2x128xf32> to vector<2x32xf32>
    %66 = vector.extract_strided_slice %63 {offsets = [0, 64], sizes = [2, 32], strides = [1, 1]} : vector<2x128xf32> to vector<2x32xf32>
    %67 = vector.extract_strided_slice %62 {offsets = [0, 96], sizes = [2, 32], strides = [1, 1]} : vector<2x128xf32> to vector<2x32xf32>
    %68 = arith.mulf %65, %31 : vector<2x32xf32>
    %69 = arith.mulf %64, %66 : vector<2x32xf32>
    %70 = arith.addf %68, %69 : vector<2x32xf32>
    %71 = math.tanh %70 : vector<2x32xf32>
    %72 = arith.mulf %67, %71 : vector<2x32xf32>
    %cst_19 = arith.constant dense<0.000000e+00> : vector<2x8xf32>
    %73 = tpu.matmul %72, %3, %cst_19 {dimension_numbers = #tpu.dot_dimension_numbers<[1], [0], [0], [1], [0, 0, 1, 1], [], []>} : vector<2x32xf32>, vector<32x8xf32>, vector<2x8xf32> -> vector<2x8xf32>
    %74 = arith.addf %73, %9 : vector<2x8xf32>
    %c1 = arith.constant 1 : index
    %c0_20 = arith.constant 0 : index
    %c0_21 = arith.constant 0 : index
    %75 = vector.load %arg4[%c1, %c0_20, %c0_21] : memref<8x2x8xf32, #tpu.memory_space<vmem>>, vector<1x2x8xf32>
    %76 = vector.shape_cast %75 : vector<1x2x8xf32> to vector<2x8xf32>
    %77 = vector.shape_cast %74 : vector<2x8xf32> to vector<1x2x8xf32>
    tpu.vector_store %arg4[%c1, %c0_20, %c0_21], %77 {strides = array<i32>} : memref<8x2x8xf32, #tpu.memory_space<vmem>>, vector<1x2x8xf32>,
    %78 = vector.extract_strided_slice %11 {offsets = [1, 0, 0], sizes = [1, 2, 8], strides = [1, 1, 1]} : vector<8x2x8xf32> to vector<1x2x8xf32>
    %79 = vector.shape_cast %78 : vector<1x2x8xf32> to vector<2x8xf32>
    %80 = arith.addf %74, %79 : vector<2x8xf32>
    %cst_22 = arith.constant dense<0xFF800000> : vector<2xf32>
    %81 = vector.multi_reduction <maximumf>, %80, %cst_22 [1] : vector<2x8xf32> to vector<2xf32>
    %82 = vector.shape_cast %81 : vector<2xf32> to vector<2x1xf32>
    %83 = vector.broadcast %82 : vector<2x1xf32> to vector<2x8xf32>
    %84 = arith.cmpf oge, %80, %83 : vector<2x8xf32>
    %c8_i32_23 = arith.constant 8 : i32
    %85 = vector.broadcast %c8_i32_23 : i32 to vector<2x8xi32>
    %86 = arith.select %84, %10, %85 : vector<2x8xi1>, vector<2x8xi32>
    %cst_24 = arith.constant dense<2147483647> : vector<2xi32>
    %87 = vector.multi_reduction <minsi>, %86, %cst_24 [1] : vector<2x8xi32> to vector<2xi32>
    %88 = vector.shape_cast %87 : vector<2xi32> to vector<2x1xi32>
    %89 = vector.broadcast %88 : vector<2x1xi32> to vector<2x8xi32>
    %90 = arith.cmpi eq, %10, %89 : vector<2x8xi32>
    %91 = arith.extui %90 : vector<2x8xi1> to vector<2x8xi32>
    %92 = arith.sitofp %91 : vector<2x8xi32> to vector<2x8xf32>
    %cst_25 = arith.constant dense<0.000000e+00> : vector<2x128xf32>
    %93 = tpu.matmul %92, %1, %cst_25 {dimension_numbers = #tpu.dot_dimension_numbers<[1], [0], [0], [1], [0, 0, 1, 1], [], []>} : vector<2x8xf32>, vector<8x128xf32>, vector<2x128xf32> -> vector<2x128xf32>
    %cst_26 = arith.constant dense<0.000000e+00> : vector<2x128xf32>
    %94 = tpu.matmul %72, %2, %cst_26 {dimension_numbers = #tpu.dot_dimension_numbers<[1], [0], [0], [1], [0, 0, 1, 1], [], []>} : vector<2x32xf32>, vector<32x128xf32>, vector<2x128xf32> -> vector<2x128xf32>
    %95 = arith.addf %93, %94 : vector<2x128xf32>
    %96 = arith.addf %95, %6 : vector<2x128xf32>
    %97 = arith.negf %96 : vector<2x128xf32>
    %98 = math.exp %97 : vector<2x128xf32>
    %cst_27 = arith.constant 1.000000e+00 : f32
    %99 = vector.broadcast %cst_27 : f32 to vector<2x128xf32>
    %100 = arith.addf %99, %98 : vector<2x128xf32>
    %101 = arith.divf %99, %100 : vector<2x128xf32>
    %102 = math.tanh %96 : vector<2x128xf32>
    %103 = vector.extract_strided_slice %101 {offsets = [0, 0], sizes = [2, 32], strides = [1, 1]} : vector<2x128xf32> to vector<2x32xf32>
    %104 = vector.extract_strided_slice %101 {offsets = [0, 32], sizes = [2, 32], strides = [1, 1]} : vector<2x128xf32> to vector<2x32xf32>
    %105 = vector.extract_strided_slice %102 {offsets = [0, 64], sizes = [2, 32], strides = [1, 1]} : vector<2x128xf32> to vector<2x32xf32>
    %106 = vector.extract_strided_slice %101 {offsets = [0, 96], sizes = [2, 32], strides = [1, 1]} : vector<2x128xf32> to vector<2x32xf32>
    %107 = arith.mulf %104, %70 : vector<2x32xf32>
    %108 = arith.mulf %103, %105 : vector<2x32xf32>
    %109 = arith.addf %107, %108 : vector<2x32xf32>
    %110 = math.tanh %109 : vector<2x32xf32>
    %111 = arith.mulf %106, %110 : vector<2x32xf32>
    %cst_28 = arith.constant dense<0.000000e+00> : vector<2x8xf32>
    %112 = tpu.matmul %111, %3, %cst_28 {dimension_numbers = #tpu.dot_dimension_numbers<[1], [0], [0], [1], [0, 0, 1, 1], [], []>} : vector<2x32xf32>, vector<32x8xf32>, vector<2x8xf32> -> vector<2x8xf32>
    %113 = arith.addf %112, %9 : vector<2x8xf32>
    %c2 = arith.constant 2 : index
    %c0_29 = arith.constant 0 : index
    %c0_30 = arith.constant 0 : index
    %114 = vector.load %arg4[%c2, %c0_29, %c0_30] : memref<8x2x8xf32, #tpu.memory_space<vmem>>, vector<1x2x8xf32>
    %115 = vector.shape_cast %114 : vector<1x2x8xf32> to vector<2x8xf32>
    %116 = vector.shape_cast %113 : vector<2x8xf32> to vector<1x2x8xf32>
    tpu.vector_store %arg4[%c2, %c0_29, %c0_30], %116 {strides = array<i32>} : memref<8x2x8xf32, #tpu.memory_space<vmem>>, vector<1x2x8xf32>,
    %117 = vector.extract_strided_slice %11 {offsets = [2, 0, 0], sizes = [1, 2, 8], strides = [1, 1, 1]} : vector<8x2x8xf32> to vector<1x2x8xf32>
    %118 = vector.shape_cast %117 : vector<1x2x8xf32> to vector<2x8xf32>
    %119 = arith.addf %113, %118 : vector<2x8xf32>
    %cst_31 = arith.constant dense<0xFF800000> : vector<2xf32>
    %120 = vector.multi_reduction <maximumf>, %119, %cst_31 [1] : vector<2x8xf32> to vector<2xf32>
    %121 = vector.shape_cast %120 : vector<2xf32> to vector<2x1xf32>
    %122 = vector.broadcast %121 : vector<2x1xf32> to vector<2x8xf32>
    %123 = arith.cmpf oge, %119, %122 : vector<2x8xf32>
    %c8_i32_32 = arith.constant 8 : i32
    %124 = vector.broadcast %c8_i32_32 : i32 to vector<2x8xi32>
    %125 = arith.select %123, %10, %124 : vector<2x8xi1>, vector<2x8xi32>
    %cst_33 = arith.constant dense<2147483647> : vector<2xi32>
    %126 = vector.multi_reduction <minsi>, %125, %cst_33 [1] : vector<2x8xi32> to vector<2xi32>
    %127 = vector.shape_cast %126 : vector<2xi32> to vector<2x1xi32>
    %128 = vector.broadcast %127 : vector<2x1xi32> to vector<2x8xi32>
    %129 = arith.cmpi eq, %10, %128 : vector<2x8xi32>
    %130 = arith.extui %129 : vector<2x8xi1> to vector<2x8xi32>
    %131 = arith.sitofp %130 : vector<2x8xi32> to vector<2x8xf32>
    %cst_34 = arith.constant dense<0.000000e+00> : vector<2x128xf32>
    %132 = tpu.matmul %131, %1, %cst_34 {dimension_numbers = #tpu.dot_dimension_numbers<[1], [0], [0], [1], [0, 0, 1, 1], [], []>} : vector<2x8xf32>, vector<8x128xf32>, vector<2x128xf32> -> vector<2x128xf32>
    %cst_35 = arith.constant dense<0.000000e+00> : vector<2x128xf32>
    %133 = tpu.matmul %111, %2, %cst_35 {dimension_numbers = #tpu.dot_dimension_numbers<[1], [0], [0], [1], [0, 0, 1, 1], [], []>} : vector<2x32xf32>, vector<32x128xf32>, vector<2x128xf32> -> vector<2x128xf32>
    %134 = arith.addf %132, %133 : vector<2x128xf32>
    %135 = arith.addf %134, %6 : vector<2x128xf32>
    %136 = arith.negf %135 : vector<2x128xf32>
    %137 = math.exp %136 : vector<2x128xf32>
    %cst_36 = arith.constant 1.000000e+00 : f32
    %138 = vector.broadcast %cst_36 : f32 to vector<2x128xf32>
    %139 = arith.addf %138, %137 : vector<2x128xf32>
    %140 = arith.divf %138, %139 : vector<2x128xf32>
    %141 = math.tanh %135 : vector<2x128xf32>
    %142 = vector.extract_strided_slice %140 {offsets = [0, 0], sizes = [2, 32], strides = [1, 1]} : vector<2x128xf32> to vector<2x32xf32>
    %143 = vector.extract_strided_slice %140 {offsets = [0, 32], sizes = [2, 32], strides = [1, 1]} : vector<2x128xf32> to vector<2x32xf32>
    %144 = vector.extract_strided_slice %141 {offsets = [0, 64], sizes = [2, 32], strides = [1, 1]} : vector<2x128xf32> to vector<2x32xf32>
    %145 = vector.extract_strided_slice %140 {offsets = [0, 96], sizes = [2, 32], strides = [1, 1]} : vector<2x128xf32> to vector<2x32xf32>
    %146 = arith.mulf %143, %109 : vector<2x32xf32>
    %147 = arith.mulf %142, %144 : vector<2x32xf32>
    %148 = arith.addf %146, %147 : vector<2x32xf32>
    %149 = math.tanh %148 : vector<2x32xf32>
    %150 = arith.mulf %145, %149 : vector<2x32xf32>
    %cst_37 = arith.constant dense<0.000000e+00> : vector<2x8xf32>
    %151 = tpu.matmul %150, %3, %cst_37 {dimension_numbers = #tpu.dot_dimension_numbers<[1], [0], [0], [1], [0, 0, 1, 1], [], []>} : vector<2x32xf32>, vector<32x8xf32>, vector<2x8xf32> -> vector<2x8xf32>
    %152 = arith.addf %151, %9 : vector<2x8xf32>
    %c3 = arith.constant 3 : index
    %c0_38 = arith.constant 0 : index
    %c0_39 = arith.constant 0 : index
    %153 = vector.load %arg4[%c3, %c0_38, %c0_39] : memref<8x2x8xf32, #tpu.memory_space<vmem>>, vector<1x2x8xf32>
    %154 = vector.shape_cast %153 : vector<1x2x8xf32> to vector<2x8xf32>
    %155 = vector.shape_cast %152 : vector<2x8xf32> to vector<1x2x8xf32>
    tpu.vector_store %arg4[%c3, %c0_38, %c0_39], %155 {strides = array<i32>} : memref<8x2x8xf32, #tpu.memory_space<vmem>>, vector<1x2x8xf32>,
    %156 = vector.extract_strided_slice %11 {offsets = [3, 0, 0], sizes = [1, 2, 8], strides = [1, 1, 1]} : vector<8x2x8xf32> to vector<1x2x8xf32>
    %157 = vector.shape_cast %156 : vector<1x2x8xf32> to vector<2x8xf32>
    %158 = arith.addf %152, %157 : vector<2x8xf32>
    %cst_40 = arith.constant dense<0xFF800000> : vector<2xf32>
    %159 = vector.multi_reduction <maximumf>, %158, %cst_40 [1] : vector<2x8xf32> to vector<2xf32>
    %160 = vector.shape_cast %159 : vector<2xf32> to vector<2x1xf32>
    %161 = vector.broadcast %160 : vector<2x1xf32> to vector<2x8xf32>
    %162 = arith.cmpf oge, %158, %161 : vector<2x8xf32>
    %c8_i32_41 = arith.constant 8 : i32
    %163 = vector.broadcast %c8_i32_41 : i32 to vector<2x8xi32>
    %164 = arith.select %162, %10, %163 : vector<2x8xi1>, vector<2x8xi32>
    %cst_42 = arith.constant dense<2147483647> : vector<2xi32>
    %165 = vector.multi_reduction <minsi>, %164, %cst_42 [1] : vector<2x8xi32> to vector<2xi32>
    %166 = vector.shape_cast %165 : vector<2xi32> to vector<2x1xi32>
    %167 = vector.broadcast %166 : vector<2x1xi32> to vector<2x8xi32>
    %168 = arith.cmpi eq, %10, %167 : vector<2x8xi32>
    %169 = arith.extui %168 : vector<2x8xi1> to vector<2x8xi32>
    %170 = arith.sitofp %169 : vector<2x8xi32> to vector<2x8xf32>
    %cst_43 = arith.constant dense<0.000000e+00> : vector<2x128xf32>
    %171 = tpu.matmul %170, %1, %cst_43 {dimension_numbers = #tpu.dot_dimension_numbers<[1], [0], [0], [1], [0, 0, 1, 1], [], []>} : vector<2x8xf32>, vector<8x128xf32>, vector<2x128xf32> -> vector<2x128xf32>
    %cst_44 = arith.constant dense<0.000000e+00> : vector<2x128xf32>
    %172 = tpu.matmul %150, %2, %cst_44 {dimension_numbers = #tpu.dot_dimension_numbers<[1], [0], [0], [1], [0, 0, 1, 1], [], []>} : vector<2x32xf32>, vector<32x128xf32>, vector<2x128xf32> -> vector<2x128xf32>
    %173 = arith.addf %171, %172 : vector<2x128xf32>
    %174 = arith.addf %173, %6 : vector<2x128xf32>
    %175 = arith.negf %174 : vector<2x128xf32>
    %176 = math.exp %175 : vector<2x128xf32>
    %cst_45 = arith.constant 1.000000e+00 : f32
    %177 = vector.broadcast %cst_45 : f32 to vector<2x128xf32>
    %178 = arith.addf %177, %176 : vector<2x128xf32>
    %179 = arith.divf %177, %178 : vector<2x128xf32>
    %180 = math.tanh %174 : vector<2x128xf32>
    %181 = vector.extract_strided_slice %179 {offsets = [0, 0], sizes = [2, 32], strides = [1, 1]} : vector<2x128xf32> to vector<2x32xf32>
    %182 = vector.extract_strided_slice %179 {offsets = [0, 32], sizes = [2, 32], strides = [1, 1]} : vector<2x128xf32> to vector<2x32xf32>
    %183 = vector.extract_strided_slice %180 {offsets = [0, 64], sizes = [2, 32], strides = [1, 1]} : vector<2x128xf32> to vector<2x32xf32>
    %184 = vector.extract_strided_slice %179 {offsets = [0, 96], sizes = [2, 32], strides = [1, 1]} : vector<2x128xf32> to vector<2x32xf32>
    %185 = arith.mulf %182, %148 : vector<2x32xf32>
    %186 = arith.mulf %181, %183 : vector<2x32xf32>
    %187 = arith.addf %185, %186 : vector<2x32xf32>
    %188 = math.tanh %187 : vector<2x32xf32>
    %189 = arith.mulf %184, %188 : vector<2x32xf32>
    %cst_46 = arith.constant dense<0.000000e+00> : vector<2x8xf32>
    %190 = tpu.matmul %189, %3, %cst_46 {dimension_numbers = #tpu.dot_dimension_numbers<[1], [0], [0], [1], [0, 0, 1, 1], [], []>} : vector<2x32xf32>, vector<32x8xf32>, vector<2x8xf32> -> vector<2x8xf32>
    %191 = arith.addf %190, %9 : vector<2x8xf32>
    %c4 = arith.constant 4 : index
    %c0_47 = arith.constant 0 : index
    %c0_48 = arith.constant 0 : index
    %192 = vector.load %arg4[%c4, %c0_47, %c0_48] : memref<8x2x8xf32, #tpu.memory_space<vmem>>, vector<1x2x8xf32>
    %193 = vector.shape_cast %192 : vector<1x2x8xf32> to vector<2x8xf32>
    %194 = vector.shape_cast %191 : vector<2x8xf32> to vector<1x2x8xf32>
    tpu.vector_store %arg4[%c4, %c0_47, %c0_48], %194 {strides = array<i32>} : memref<8x2x8xf32, #tpu.memory_space<vmem>>, vector<1x2x8xf32>,
    %195 = vector.extract_strided_slice %11 {offsets = [4, 0, 0], sizes = [1, 2, 8], strides = [1, 1, 1]} : vector<8x2x8xf32> to vector<1x2x8xf32>
    %196 = vector.shape_cast %195 : vector<1x2x8xf32> to vector<2x8xf32>
    %197 = arith.addf %191, %196 : vector<2x8xf32>
    %cst_49 = arith.constant dense<0xFF800000> : vector<2xf32>
    %198 = vector.multi_reduction <maximumf>, %197, %cst_49 [1] : vector<2x8xf32> to vector<2xf32>
    %199 = vector.shape_cast %198 : vector<2xf32> to vector<2x1xf32>
    %200 = vector.broadcast %199 : vector<2x1xf32> to vector<2x8xf32>
    %201 = arith.cmpf oge, %197, %200 : vector<2x8xf32>
    %c8_i32_50 = arith.constant 8 : i32
    %202 = vector.broadcast %c8_i32_50 : i32 to vector<2x8xi32>
    %203 = arith.select %201, %10, %202 : vector<2x8xi1>, vector<2x8xi32>
    %cst_51 = arith.constant dense<2147483647> : vector<2xi32>
    %204 = vector.multi_reduction <minsi>, %203, %cst_51 [1] : vector<2x8xi32> to vector<2xi32>
    %205 = vector.shape_cast %204 : vector<2xi32> to vector<2x1xi32>
    %206 = vector.broadcast %205 : vector<2x1xi32> to vector<2x8xi32>
    %207 = arith.cmpi eq, %10, %206 : vector<2x8xi32>
    %208 = arith.extui %207 : vector<2x8xi1> to vector<2x8xi32>
    %209 = arith.sitofp %208 : vector<2x8xi32> to vector<2x8xf32>
    %cst_52 = arith.constant dense<0.000000e+00> : vector<2x128xf32>
    %210 = tpu.matmul %209, %1, %cst_52 {dimension_numbers = #tpu.dot_dimension_numbers<[1], [0], [0], [1], [0, 0, 1, 1], [], []>} : vector<2x8xf32>, vector<8x128xf32>, vector<2x128xf32> -> vector<2x128xf32>
    %cst_53 = arith.constant dense<0.000000e+00> : vector<2x128xf32>
    %211 = tpu.matmul %189, %2, %cst_53 {dimension_numbers = #tpu.dot_dimension_numbers<[1], [0], [0], [1], [0, 0, 1, 1], [], []>} : vector<2x32xf32>, vector<32x128xf32>, vector<2x128xf32> -> vector<2x128xf32>
    %212 = arith.addf %210, %211 : vector<2x128xf32>
    %213 = arith.addf %212, %6 : vector<2x128xf32>
    %214 = arith.negf %213 : vector<2x128xf32>
    %215 = math.exp %214 : vector<2x128xf32>
    %cst_54 = arith.constant 1.000000e+00 : f32
    %216 = vector.broadcast %cst_54 : f32 to vector<2x128xf32>
    %217 = arith.addf %216, %215 : vector<2x128xf32>
    %218 = arith.divf %216, %217 : vector<2x128xf32>
    %219 = math.tanh %213 : vector<2x128xf32>
    %220 = vector.extract_strided_slice %218 {offsets = [0, 0], sizes = [2, 32], strides = [1, 1]} : vector<2x128xf32> to vector<2x32xf32>
    %221 = vector.extract_strided_slice %218 {offsets = [0, 32], sizes = [2, 32], strides = [1, 1]} : vector<2x128xf32> to vector<2x32xf32>
    %222 = vector.extract_strided_slice %219 {offsets = [0, 64], sizes = [2, 32], strides = [1, 1]} : vector<2x128xf32> to vector<2x32xf32>
    %223 = vector.extract_strided_slice %218 {offsets = [0, 96], sizes = [2, 32], strides = [1, 1]} : vector<2x128xf32> to vector<2x32xf32>
    %224 = arith.mulf %221, %187 : vector<2x32xf32>
    %225 = arith.mulf %220, %222 : vector<2x32xf32>
    %226 = arith.addf %224, %225 : vector<2x32xf32>
    %227 = math.tanh %226 : vector<2x32xf32>
    %228 = arith.mulf %223, %227 : vector<2x32xf32>
    %cst_55 = arith.constant dense<0.000000e+00> : vector<2x8xf32>
    %229 = tpu.matmul %228, %3, %cst_55 {dimension_numbers = #tpu.dot_dimension_numbers<[1], [0], [0], [1], [0, 0, 1, 1], [], []>} : vector<2x32xf32>, vector<32x8xf32>, vector<2x8xf32> -> vector<2x8xf32>
    %230 = arith.addf %229, %9 : vector<2x8xf32>
    %c5 = arith.constant 5 : index
    %c0_56 = arith.constant 0 : index
    %c0_57 = arith.constant 0 : index
    %231 = vector.load %arg4[%c5, %c0_56, %c0_57] : memref<8x2x8xf32, #tpu.memory_space<vmem>>, vector<1x2x8xf32>
    %232 = vector.shape_cast %231 : vector<1x2x8xf32> to vector<2x8xf32>
    %233 = vector.shape_cast %230 : vector<2x8xf32> to vector<1x2x8xf32>
    tpu.vector_store %arg4[%c5, %c0_56, %c0_57], %233 {strides = array<i32>} : memref<8x2x8xf32, #tpu.memory_space<vmem>>, vector<1x2x8xf32>,
    %234 = vector.extract_strided_slice %11 {offsets = [5, 0, 0], sizes = [1, 2, 8], strides = [1, 1, 1]} : vector<8x2x8xf32> to vector<1x2x8xf32>
    %235 = vector.shape_cast %234 : vector<1x2x8xf32> to vector<2x8xf32>
    %236 = arith.addf %230, %235 : vector<2x8xf32>
    %cst_58 = arith.constant dense<0xFF800000> : vector<2xf32>
    %237 = vector.multi_reduction <maximumf>, %236, %cst_58 [1] : vector<2x8xf32> to vector<2xf32>
    %238 = vector.shape_cast %237 : vector<2xf32> to vector<2x1xf32>
    %239 = vector.broadcast %238 : vector<2x1xf32> to vector<2x8xf32>
    %240 = arith.cmpf oge, %236, %239 : vector<2x8xf32>
    %c8_i32_59 = arith.constant 8 : i32
    %241 = vector.broadcast %c8_i32_59 : i32 to vector<2x8xi32>
    %242 = arith.select %240, %10, %241 : vector<2x8xi1>, vector<2x8xi32>
    %cst_60 = arith.constant dense<2147483647> : vector<2xi32>
    %243 = vector.multi_reduction <minsi>, %242, %cst_60 [1] : vector<2x8xi32> to vector<2xi32>
    %244 = vector.shape_cast %243 : vector<2xi32> to vector<2x1xi32>
    %245 = vector.broadcast %244 : vector<2x1xi32> to vector<2x8xi32>
    %246 = arith.cmpi eq, %10, %245 : vector<2x8xi32>
    %247 = arith.extui %246 : vector<2x8xi1> to vector<2x8xi32>
    %248 = arith.sitofp %247 : vector<2x8xi32> to vector<2x8xf32>
    %cst_61 = arith.constant dense<0.000000e+00> : vector<2x128xf32>
    %249 = tpu.matmul %248, %1, %cst_61 {dimension_numbers = #tpu.dot_dimension_numbers<[1], [0], [0], [1], [0, 0, 1, 1], [], []>} : vector<2x8xf32>, vector<8x128xf32>, vector<2x128xf32> -> vector<2x128xf32>
    %cst_62 = arith.constant dense<0.000000e+00> : vector<2x128xf32>
    %250 = tpu.matmul %228, %2, %cst_62 {dimension_numbers = #tpu.dot_dimension_numbers<[1], [0], [0], [1], [0, 0, 1, 1], [], []>} : vector<2x32xf32>, vector<32x128xf32>, vector<2x128xf32> -> vector<2x128xf32>
    %251 = arith.addf %249, %250 : vector<2x128xf32>
    %252 = arith.addf %251, %6 : vector<2x128xf32>
    %253 = arith.negf %252 : vector<2x128xf32>
    %254 = math.exp %253 : vector<2x128xf32>
    %cst_63 = arith.constant 1.000000e+00 : f32
    %255 = vector.broadcast %cst_63 : f32 to vector<2x128xf32>
    %256 = arith.addf %255, %254 : vector<2x128xf32>
    %257 = arith.divf %255, %256 : vector<2x128xf32>
    %258 = math.tanh %252 : vector<2x128xf32>
    %259 = vector.extract_strided_slice %257 {offsets = [0, 0], sizes = [2, 32], strides = [1, 1]} : vector<2x128xf32> to vector<2x32xf32>
    %260 = vector.extract_strided_slice %257 {offsets = [0, 32], sizes = [2, 32], strides = [1, 1]} : vector<2x128xf32> to vector<2x32xf32>
    %261 = vector.extract_strided_slice %258 {offsets = [0, 64], sizes = [2, 32], strides = [1, 1]} : vector<2x128xf32> to vector<2x32xf32>
    %262 = vector.extract_strided_slice %257 {offsets = [0, 96], sizes = [2, 32], strides = [1, 1]} : vector<2x128xf32> to vector<2x32xf32>
    %263 = arith.mulf %260, %226 : vector<2x32xf32>
    %264 = arith.mulf %259, %261 : vector<2x32xf32>
    %265 = arith.addf %263, %264 : vector<2x32xf32>
    %266 = math.tanh %265 : vector<2x32xf32>
    %267 = arith.mulf %262, %266 : vector<2x32xf32>
    %cst_64 = arith.constant dense<0.000000e+00> : vector<2x8xf32>
    %268 = tpu.matmul %267, %3, %cst_64 {dimension_numbers = #tpu.dot_dimension_numbers<[1], [0], [0], [1], [0, 0, 1, 1], [], []>} : vector<2x32xf32>, vector<32x8xf32>, vector<2x8xf32> -> vector<2x8xf32>
    %269 = arith.addf %268, %9 : vector<2x8xf32>
    %c6 = arith.constant 6 : index
    %c0_65 = arith.constant 0 : index
    %c0_66 = arith.constant 0 : index
    %270 = vector.load %arg4[%c6, %c0_65, %c0_66] : memref<8x2x8xf32, #tpu.memory_space<vmem>>, vector<1x2x8xf32>
    %271 = vector.shape_cast %270 : vector<1x2x8xf32> to vector<2x8xf32>
    %272 = vector.shape_cast %269 : vector<2x8xf32> to vector<1x2x8xf32>
    tpu.vector_store %arg4[%c6, %c0_65, %c0_66], %272 {strides = array<i32>} : memref<8x2x8xf32, #tpu.memory_space<vmem>>, vector<1x2x8xf32>,
    %273 = vector.extract_strided_slice %11 {offsets = [6, 0, 0], sizes = [1, 2, 8], strides = [1, 1, 1]} : vector<8x2x8xf32> to vector<1x2x8xf32>
    %274 = vector.shape_cast %273 : vector<1x2x8xf32> to vector<2x8xf32>
    %275 = arith.addf %269, %274 : vector<2x8xf32>
    %cst_67 = arith.constant dense<0xFF800000> : vector<2xf32>
    %276 = vector.multi_reduction <maximumf>, %275, %cst_67 [1] : vector<2x8xf32> to vector<2xf32>
    %277 = vector.shape_cast %276 : vector<2xf32> to vector<2x1xf32>
    %278 = vector.broadcast %277 : vector<2x1xf32> to vector<2x8xf32>
    %279 = arith.cmpf oge, %275, %278 : vector<2x8xf32>
    %c8_i32_68 = arith.constant 8 : i32
    %280 = vector.broadcast %c8_i32_68 : i32 to vector<2x8xi32>
    %281 = arith.select %279, %10, %280 : vector<2x8xi1>, vector<2x8xi32>
    %cst_69 = arith.constant dense<2147483647> : vector<2xi32>
    %282 = vector.multi_reduction <minsi>, %281, %cst_69 [1] : vector<2x8xi32> to vector<2xi32>
    %283 = vector.shape_cast %282 : vector<2xi32> to vector<2x1xi32>
    %284 = vector.broadcast %283 : vector<2x1xi32> to vector<2x8xi32>
    %285 = arith.cmpi eq, %10, %284 : vector<2x8xi32>
    %286 = arith.extui %285 : vector<2x8xi1> to vector<2x8xi32>
    %287 = arith.sitofp %286 : vector<2x8xi32> to vector<2x8xf32>
    %cst_70 = arith.constant dense<0.000000e+00> : vector<2x128xf32>
    %288 = tpu.matmul %287, %1, %cst_70 {dimension_numbers = #tpu.dot_dimension_numbers<[1], [0], [0], [1], [0, 0, 1, 1], [], []>} : vector<2x8xf32>, vector<8x128xf32>, vector<2x128xf32> -> vector<2x128xf32>
    %cst_71 = arith.constant dense<0.000000e+00> : vector<2x128xf32>
    %289 = tpu.matmul %267, %2, %cst_71 {dimension_numbers = #tpu.dot_dimension_numbers<[1], [0], [0], [1], [0, 0, 1, 1], [], []>} : vector<2x32xf32>, vector<32x128xf32>, vector<2x128xf32> -> vector<2x128xf32>
    %290 = arith.addf %288, %289 : vector<2x128xf32>
    %291 = arith.addf %290, %6 : vector<2x128xf32>
    %292 = arith.negf %291 : vector<2x128xf32>
    %293 = math.exp %292 : vector<2x128xf32>
    %cst_72 = arith.constant 1.000000e+00 : f32
    %294 = vector.broadcast %cst_72 : f32 to vector<2x128xf32>
    %295 = arith.addf %294, %293 : vector<2x128xf32>
    %296 = arith.divf %294, %295 : vector<2x128xf32>
    %297 = math.tanh %291 : vector<2x128xf32>
    %298 = vector.extract_strided_slice %296 {offsets = [0, 0], sizes = [2, 32], strides = [1, 1]} : vector<2x128xf32> to vector<2x32xf32>
    %299 = vector.extract_strided_slice %296 {offsets = [0, 32], sizes = [2, 32], strides = [1, 1]} : vector<2x128xf32> to vector<2x32xf32>
    %300 = vector.extract_strided_slice %297 {offsets = [0, 64], sizes = [2, 32], strides = [1, 1]} : vector<2x128xf32> to vector<2x32xf32>
    %301 = vector.extract_strided_slice %296 {offsets = [0, 96], sizes = [2, 32], strides = [1, 1]} : vector<2x128xf32> to vector<2x32xf32>
    %302 = arith.mulf %299, %265 : vector<2x32xf32>
    %303 = arith.mulf %298, %300 : vector<2x32xf32>
    %304 = arith.addf %302, %303 : vector<2x32xf32>
    %305 = math.tanh %304 : vector<2x32xf32>
    %306 = arith.mulf %301, %305 : vector<2x32xf32>
    %cst_73 = arith.constant dense<0.000000e+00> : vector<2x8xf32>
    %307 = tpu.matmul %306, %3, %cst_73 {dimension_numbers = #tpu.dot_dimension_numbers<[1], [0], [0], [1], [0, 0, 1, 1], [], []>} : vector<2x32xf32>, vector<32x8xf32>, vector<2x8xf32> -> vector<2x8xf32>
    %308 = arith.addf %307, %9 : vector<2x8xf32>
    %c7 = arith.constant 7 : index
    %c0_74 = arith.constant 0 : index
    %c0_75 = arith.constant 0 : index
    %309 = vector.load %arg4[%c7, %c0_74, %c0_75] : memref<8x2x8xf32, #tpu.memory_space<vmem>>, vector<1x2x8xf32>
    %310 = vector.shape_cast %309 : vector<1x2x8xf32> to vector<2x8xf32>
    %311 = vector.shape_cast %308 : vector<2x8xf32> to vector<1x2x8xf32>
    tpu.vector_store %arg4[%c7, %c0_74, %c0_75], %311 {strides = array<i32>} : memref<8x2x8xf32, #tpu.memory_space<vmem>>, vector<1x2x8xf32>,
    return
  }
  func.func @transform_0(%arg0: i32) -> (i32, i32) {
    %c0_i32 = arith.constant 0 : i32
    %c0_i32_0 = arith.constant 0 : i32
    return %arg0, %c0_i32 : i32, i32
  }
  func.func @transform_1(%arg0: i32) -> (i32, i32) {
    %c0_i32 = arith.constant 0 : i32
    %c0_i32_0 = arith.constant 0 : i32
    %c0_i32_1 = arith.constant 0 : i32
    return %c0_i32, %c0_i32_0 : i32, i32
  }
  func.func @transform_2(%arg0: i32) -> (i32, i32, i32) {
    %c0_i32 = arith.constant 0 : i32
    %c0_i32_0 = arith.constant 0 : i32
    %c0_i32_1 = arith.constant 0 : i32
    return %c0_i32, %arg0, %c0_i32_0 : i32, i32, i32
  }
  func.func @transform_3(%arg0: i32) -> (i32, i32, i32) {
    %c0_i32 = arith.constant 0 : i32
    %c0_i32_0 = arith.constant 0 : i32
    %c0_i32_1 = arith.constant 0 : i32
    return %c0_i32, %arg0, %c0_i32_0 : i32, i32, i32
  }
}

</mosaic_0001>

<bundles_post_ra>
// kernel: tpu_custom_call.1
= control target key start
LH: loop header
LB: loop body
LE: loop exit
PB: predicated region body
PF: predicated region fallthrough
CT: control target
= control target key end

     0   :  { %8 = vsyncpa [#allocation3], 0  ;;  %s3155_s0 = inlined_call_operand.hbm [shape: f32[2,32], index: 0, kind: input, shape index: {}]   ;;  %s3156_s1 = inlined_call_operand.hbm [shape: f32[88,128], index: 1, kind: input, shape index: {}]   ;;  %s3157_s2 = inlined_call_operand.hbm [shape: f32[8,2,8], index: 2, kind: input, shape index: {}]   ;;  %s3158_s3 = inlined_call_operand.hbm [shape: f32[8,2,8], index: 3, kind: output, shape index: {}]  }
   0x1   :  { %9 = vsyncpa [#allocation6], 0 }
   0x2   :  { %10 = vsyncpa [#allocation4], 0  ;;  %s2750_s12 = smov [#allocation5]  }
   0x3   :  { %s26_s13 = sshll.u32 %s2750_s12, 4  ;;  %s27_s13 = int_to_ptr.vmem [resolvable:$true] %s26_s13 }
   0x4   :  { %s2672_s14 = scalar_lea.vmem %s27_s13, 1408  ;;  %p2677_p1 = scmp.lt.s32.totalorder %s27_s13, %s27_s13 }
   0x5   :  { %p2673_p0 = scmp.ne.s32.totalorder %s27_s13, %s2672_s14  ;;  %p2678_p2 = scmp.lt.s32.totalorder %s2672_s14, %s2672_s14 }
   0x7   :  { %p2679_p3 = por %p2678_p2, %p2677_p1 }
   0x9   :  { %p2680_p4 = pnand %p2679_p3, %p2673_p0 }
   0xb   :  { %2683 = shalt.err (!%p2680_p4)
}
   0xc   :  { %s2751_s15 = smov 128   ;;  %s2752_s16 = smov 8  }
   0xd   :  { %32 = dma.hbm_to_vmem [thread:$0]  %s3156_s1, 1408, %s27_s13, [#allocation6], %s2751_s15, %s2751_s15, %s2752_s16  }
   0xe   :  { %s2753_s19 = smov [#allocation2]   ;;  %s2754_s21 = smov [#allocation7]  }
   0xf   :  { %s17_s20 = sshll.u32 %s2753_s19, 4  ;;  %s38_s22 = sshll.u32 %s2754_s21, 4  ;;  %s18_s20 = int_to_ptr.vmem [resolvable:$true] %s17_s20  ;;  %s39_s22 = int_to_ptr.vmem [resolvable:$true] %s38_s22 }
  0x10   :  { %s2692_s23 = scalar_lea.vmem %s18_s20, 32  ;;  %p2697_p6 = scmp.lt.s32.totalorder %s18_s20, %s18_s20 }
  0x11   :  { %p2693_p5 = scmp.ne.s32.totalorder %s18_s20, %s2692_s23  ;;  %p2698_p7 = scmp.lt.s32.totalorder %s2692_s23, %s2692_s23 }
  0x13   :  { %p2699_p8 = por %p2698_p7, %p2697_p6 }
  0x15   :  { %p2700_p9 = pnand %p2699_p8, %p2693_p5 }
  0x17   :  { %2703 = shalt.err (!%p2700_p9)
}
  0x18   :  { %20 = dma.hbm_to_vmem [thread:$0]  %s3155_s0, 32, %s18_s20, [#allocation3]  }
  0x19   :  { %s2712_s26 = scalar_lea.vmem %s39_s22, 256  ;;  %p2717_p11 = scmp.lt.s32.totalorder %s39_s22, %s39_s22 }
  0x1a   :  { %p2713_p10 = scmp.ne.s32.totalorder %s39_s22, %s2712_s26  ;;  %p2718_p12 = scmp.lt.s32.totalorder %s2712_s26, %s2712_s26 }
  0x1c   :  { %p2719_p13 = por %p2718_p12, %p2717_p11 }
  0x1e   :  { %p2720_p0 = pnand %p2719_p13, %p2713_p10 }
  0x20   :  { %2723 = shalt.err (!%p2720_p0)
}
  0x21   :  { %s2755_s1 = smov 32   ;;  %s2756_s27 = smov 2  }
  0x22   :  { %44 = dma.hbm_to_vmem [thread:$0]  %s3157_s2, 256, %s39_s22, [#allocation6], %s2755_s1, %s2755_s1, %s2756_s27  }
  0x23   :  { %2744 = dma.done.wait [#allocation3], 32  }
  0x24   :  { %2745 = vsyncadd [#allocation3], 4294967264 }
  0x25   :  { %2746 = dma.done.wait [#allocation6], 1664  }
  0x26   :  { %2747 = vsyncadd [#allocation6], 4294965632  ;;  %v2757_v0 = vmov 0.0   ;;  %vm2758_vm0 = vmmov 0   ;;  %v2799_v1 = vld [vmem:[#allocation5 + $0x20] sm:$0xff]  ;;  %v2801_v2 = vld [vmem:[#allocation5 + $0x18] sm:$0xff]  ;;  %v65_v7 = vlaneseq }
  0x27   :  { %2368 = vmatprep.subr.mxu0 %v2757_v0  ;;  %2376 = vmatprep.mubr.msk.f32.mxu0 %vm2758_vm0, %v2757_v0  ;;  %v2805_v3 = vld [vmem:[#allocation5 + $0x10] sm:$0xff]  ;;  %v2809_v4 = vld [vmem:[#allocation5 + $0x8] sm:$0xff]  ;;  %v82_v5 = vld [vmem:[#allocation2] sm:$0x3]  ;;  %vm83_vm1 = vcmask 261120   ;;  %s2759_s0 = smov 64  }
  0x28   :  { %2384 = vmatprep.subr.mxu1 %v2757_v0  ;;  %2392 = vmatprep.mubr.msk.f32.mxu1 %vm2758_vm0, %v2757_v0  ;;  %v2813_v6 = vld [vmem:[#allocation5] sm:$0xff]  ;;  %v66_v8 = vshrl.u32 %v65_v7, 7  ;;  %v63_v11 = vld [vmem:[#allocation5 + $0x48] sm:$0xff]  ;;  %v2844_v29 = vld [vmem:[#allocation5 + $0x38] sm:$0xff]  ;;  %vm331_vm2 = vcmask 58368   ;;  %v2882_v46 = vand.u32 127, %v65_v7 }
  0x29   :  { %2369 = vmatpush3.msra.mxu0 %v2799_v1  ;;  %v2842_v28 = vld [vmem:[#allocation5 + $0x40] sm:$0xff]  ;;  %v2848_v30 = vld [vmem:[#allocation5 + $0x30] sm:$0xff]  ;;  %v2852_v31 = vld [vmem:[#allocation5 + $0x28] sm:$0xff]  ;;  %vm157_vm5 = vcmask 64512   ;;  %s2760_s2 = smov [#allocation8]  }
  0x2a   :  { %2370 = vmatprep.subr.mxu0 %v2757_v0  ;;  %v67_v9 = vsub.s32 0, %v66_v8  ;;  %2385 = vmatpush3.msra.mxu1 %v2842_v28  ;;  %v64_v36 = vld [vmem:[#allocation5 + $0x50] sm:$0xff]  ;;  %v75_v40 = vld [vmem:[#allocation7] sm:$0x3]  ;;  %s2221_s30 = sshll.u32 %s2760_s2, 4  ;;  %s2222_s30 = int_to_ptr.vmem [resolvable:$true] %s2221_s30 }
  0x2b   :  { %2371 = vmatpush3.msra.mxu0 %v2801_v2  ;;  %2386 = vmatprep.subr.mxu1 %v2757_v0  ;;  %s2724_s4 = scalar_lea.vmem %s2222_s30, 256  ;;  %p2729_p2 = scmp.lt.s32.totalorder %s2222_s30, %s2222_s30 }
  0x2c   :  { %2372 = vmatprep.subr.mxu0 %v2757_v0  ;;  %v2834_v13 = vrot.slane %v63_v11, %v67_v9  ;;  %2387 = vmatpush3.msra.mxu1 %v2844_v29  ;;  %v2876_v37 = vrot.slane %v64_v36, %v67_v9  ;;  %p2725_p1 = scmp.ne.s32.totalorder %s2222_s30, %s2724_s4  ;;  %p2730_p3 = scmp.lt.s32.totalorder %s2724_s4, %s2724_s4 }
  0x2d   :  { %2373 = vmatpush3.msra.mxu0 %v2805_v3  ;;  %2388 = vmatprep.subr.mxu1 %v2757_v0 }
  0x2e   :  { %2374 = vmatprep.subr.mxu0 %v2757_v0  ;;  %2389 = vmatpush3.msra.mxu1 %v2848_v30  ;;  %p2731_p4 = por %p2730_p3, %p2729_p2 }
  0x2f   :  { %2375 = vmatpush3.msra.mxu0 %v2809_v4  ;;  %2390 = vmatprep.subr.mxu1 %v2757_v0 }
  0x30   :  { %2377 = vmatmul.mubr.msk.f32.vlgmr.msra.gmra.mxu0 %vm83_vm1, %v82_v5  ;;  %2379 = vmatprep.subr.mxu0 %v2757_v0  ;;  %p2732_p5 = pnand %p2731_p4, %p2725_p1 }
  0x31   :  { %2380 = vmatpush3.msra.mxu0 %v2813_v6  ;;  %2381 = vmatprep.mubr.msk.f32.mxu0 %vm2758_vm0, %v2757_v0 }
  0x32   :  { %2395 = vmatprep.subr.mxu0 %v2757_v0  ;;  %2391 = vmatpush3.msra.mxu1 %v2852_v31 }
  0x33   :  { %2406 = vmatprep.subr.mxu1 %v2757_v0 }
  0x34   :  { %2382 = vmatmul.mubr.f32.vlgmr.msra.gmra.mxu0 %v2757_v0 }
  0x35   :  { %2396 = vmatpush3.msra.mxu0 %v2799_v1  ;;  %2403 = vmatprep.mubr.msk.f32.mxu0 %vm2758_vm0, %v2757_v0 }
  0x36   :  { %2397 = vmatprep.subr.mxu0 %v2757_v0 }
  0x37   :  { %2398 = vmatpush3.msra.mxu0 %v2801_v2 }
  0x38   :  { %2399 = vmatprep.subr.mxu0 %v2757_v0 }
  0x39   :  { %2400 = vmatpush3.msra.mxu0 %v2805_v3 }
  0x3a   :  { %2401 = vmatprep.subr.mxu0 %v2757_v0 }
  0x3b   :  { %2402 = vmatpush3.msra.mxu0 %v2809_v4 }
  0x3c   :  { %2422 = vmatprep.subr.mxu0 %v2757_v0 }
  0xf0   :  { %v153_v10 = vpop.f32.mrf.mxu0 }
  0xf2   :  { %v2378_v12 = vpop.f32.mrf.mxu0 }
  0xf4   :  { %v227_v14 = vpop.f32.mrf.mxu0 }
  0xf5   :  { %v228_v15 = vadd.f32 %v227_v14, %v153_v10 }
  0xf6   :  { %v2383_v16 = vpop.f32.mrf.mxu0 }
  0xf7   :  { %v231_v17 = vadd.f32 %v228_v15, %v2834_v13 }
  0xf9   :  { %2595 = vtanh.f32 %v231_v17  ;;  %v2235_v19 = vmul.f32 -1.442695, %v231_v17 }
  0xfb   :  { %2597 = vpow2.f32 %v2235_v19 }
 0x106   :  { %v2596_v18 = vpop.eup %2595 }
 0x107   :  { %241 = vrot.lane.b32.xlu0 %v2596_v18, %s2759_s0 }
 0x108   :  { %v2598_v20 = vpop.eup %2597 }
 0x109   :  { %v235_v21 = vadd.f32 1.0, %v2598_v20 }
 0x10b   :  { %2599 = vrcp.f32 %v235_v21 }
 0x118   :  { %v2600_v22 = vpop.eup %2599 }
 0x119   :  { %v239_v25 = vmul.f32 0.0, %v2600_v22 }
 0x179   :  { %v242_v23 = vpop.permute.xlu0 %241 }
 0x17a   :  { %v244_v24 = vmul.f32 %v2600_v22, %v242_v23 }
 0x17c   :  { %246 = vrot.lane.b32.xlu0 %v244_v24, %s2755_s1 }
 0x1ee   :  { %v247_v26 = vpop.permute.xlu0 %246 }
 0x1ef   :  { %v2839_v27 = vadd.f32 %v247_v26, %v239_v25  ;;  %v76_v25 = vld [vmem:[#allocation7 + $0x2] sm:$0x3] }
 0x1f1   :  { %2601 = vtanh.f32 %v2839_v27 }
 0x1fe   :  { %v2602_v32 = vpop.eup %2601 }
 0x1ff   :  { %252 = vrot.lane.b32.xlu1 %v2602_v32, %s2759_s0 }
 0x271   :  { %v253_v33 = vpop.permute.xlu1 %252 }
 0x272   :  { %v255_v34 = vmul.f32 %v2600_v22, %v253_v33 }
 0x274   :  { %257 = vrot.lane.b32.xlu1 %v255_v34, %s2755_s1 }
 0x2e6   :  { %v258_v35 = vpop.permute.xlu1 %257 }
 0x2e7   :  { %2393 = vmatmul.mubr.msk.f32.vlgmr.msra.gmra.mxu1 %vm83_vm1, %v258_v35  ;;  %2404 = vmatmul.mubr.msk.f32.vlgmr.msra.gmra.mxu0 %vm83_vm1, %v258_v35 }
 0x2e8   :  { %2407 = vmatpush3.msra.mxu1 %v2813_v6  ;;  %2408 = vmatprep.mubr.msk.f32.mxu1 %vm2758_vm0, %v2757_v0 }
 0x2e9   :  { %2411 = vmatprep.subr.mxu1 %v2757_v0  ;;  %2423 = vmatpush3.msra.mxu0 %v2799_v1 }
 0x2ea   :  { %2424 = vmatprep.subr.mxu0 %v2757_v0  ;;  %2430 = vmatprep.mubr.msk.f32.mxu0 %vm2758_vm0, %v2757_v0 }
 0x2eb   :  { %2425 = vmatpush3.msra.mxu0 %v2801_v2 }
 0x2ec   :  { %2426 = vmatprep.subr.mxu0 %v2757_v0 }
 0x2ed   :  { %2427 = vmatpush3.msra.mxu0 %v2805_v3 }
 0x2ee   :  { %2428 = vmatprep.subr.mxu0 %v2757_v0 }
 0x2ef   :  { %2429 = vmatpush3.msra.mxu0 %v2809_v4 }
 0x2f0   :  { %2438 = vmatprep.subr.mxu0 %v2757_v0 }
 0x3a7   :  { %v327_v38 = vpop.f32.mrf.mxu1  ;;  %v423_v39 = vpop.f32.mrf.mxu0 }
 0x3a8   :  { %v328_v41 = vadd.f32 %v327_v38, %v2876_v37 }
 0x3a9   :  { %v2394_v42 = vpop.f32.mrf.mxu1  ;;  %v2405_v43 = vpop.f32.mrf.mxu0 }
 0x3aa   :  { %332 = vst.msk [vmem:[#allocation8] sm:$0x3] %vm331_vm2, %v328_v41  ;;  %v333_v44 = vadd.f32 %v328_v41, %v75_v40 }
 0x3ac   :  { %v334_v45 = vsel %vm331_vm2, %v333_v44, -inf }
 0x3ad   :  { %335 = vmax.xlane.f32.xlu0 %v334_v45 }
 0x436   :  { %v336_v47 = vpop.xlane.xlu0 %335 }
 0x437   :  { %vm337_vm3 = vcmp.ge.f32.partialorder %v333_v44, %v336_v47 }
 0x438   :  { %v338_v48 = vsel %vm337_vm3, %v2882_v46, 8 }
 0x439   :  { %v339_v49 = vsel %vm331_vm2, %v338_v48, 2147483647 }
 0x43a   :  { %v341_v50 = vshra.s32 %v339_v49, 16  ;;  %v340_v52 = vand.u32 65535, %v339_v49 }
 0x43c   :  { %v343_v51 = vcvt.s32.f32 %v341_v50  ;;  %v342_v54 = vcvt.s32.f32 %v340_v52 }
 0x43e   :  { %344 = vmin.xlane.f32.xlu1 %v343_v51 }
 0x4c7   :  { %v345_v53 = vpop.xlane.xlu1 %344 }
 0x4c8   :  { %vm346_vm4 = vcmp.eq.f32.partialorder %v343_v51, %v345_v53  ;;  %v351_v56 = vcvt.f32.s32 %v345_v53 }
 0x4c9   :  { %v347_v55 = vsel %vm346_vm4, %v342_v54, inf }
 0x4ca   :  { %348 = vmin.xlane.f32.xlu0 %v347_v55  ;;  %v352_v58 = vshll.u32 %v351_v56, 16 }
 0x553   :  { %v349_v57 = vpop.xlane.xlu0 %348 }
 0x554   :  { %v350_v59 = vcvt.f32.s32 %v349_v57 }
 0x556   :  { %v353_v60 = vadd.s32 %v352_v58, %v350_v59 }
 0x558   :  { %vm354_vm6 = vcmp.eq.s32.totalorder %v2882_v46, %v353_v60 }
 0x559   :  { %v2237_v61 = vsel %vm354_vm6, 1.0, %v2757_v0 }
 0x55a   :  { %2409 = vmatmul.mubr.msk.f32.vlgmr.msra.gmra.mxu1 %vm157_vm5, %v2237_v61 }
 0x55b   :  { %2412 = vmatpush3.msra.mxu1 %v2842_v28  ;;  %2419 = vmatprep.mubr.msk.f32.mxu1 %vm2758_vm0, %v2757_v0 }
 0x55c   :  { %2413 = vmatprep.subr.mxu1 %v2757_v0 }
 0x55d   :  { %2414 = vmatpush3.msra.mxu1 %v2844_v29 }
 0x55e   :  { %2415 = vmatprep.subr.mxu1 %v2757_v0 }
 0x55f   :  { %2416 = vmatpush3.msra.mxu1 %v2848_v30 }
 0x560   :  { %2417 = vmatprep.subr.mxu1 %v2757_v0 }
 0x561   :  { %2418 = vmatpush3.msra.mxu1 %v2852_v31 }
 0x562   :  { %2433 = vmatprep.subr.mxu1 %v2757_v0 }
 0x61a   :  { %v496_v62 = vpop.f32.mrf.mxu1 }
 0x61b   :  { %v497_v63 = vadd.f32 %v496_v62, %v423_v39 }
 0x61c   :  { %v2410_v5 = vpop.f32.mrf.mxu1 }
 0x61d   :  { %v500_v7 = vadd.f32 %v497_v63, %v2834_v13 }
 0x61f   :  { %2603 = vtanh.f32 %v500_v7  ;;  %v2240_v9 = vmul.f32 -1.442695, %v500_v7 }
 0x621   :  { %2605 = vpow2.f32 %v2240_v9 }
 0x62c   :  { %v2604_v8 = vpop.eup %2603 }
 0x62d   :  { %510 = vrot.lane.b32.xlu0 %v2604_v8, %s2759_s0 }
 0x62e   :  { %v2606_v10 = vpop.eup %2605 }
 0x62f   :  { %v504_v11 = vadd.f32 1.0, %v2606_v10 }
 0x631   :  { %2607 = vrcp.f32 %v504_v11 }
 0x63e   :  { %v2608_v12 = vpop.eup %2607 }
 0x63f   :  { %v508_v16 = vmul.f32 %v2608_v12, %v2839_v27 }
 0x69f   :  { %v511_v14 = vpop.permute.xlu0 %510 }
 0x6a0   :  { %v513_v15 = vmul.f32 %v2608_v12, %v511_v14 }
 0x6a2   :  { %515 = vrot.lane.b32.xlu1 %v513_v15, %s2755_s1  ;;  %v77_v15 = vld [vmem:[#allocation7 + $0x4] sm:$0x3] }
 0x714   :  { %v516_v17 = vpop.permute.xlu1 %515 }
 0x715   :  { %v2903_v18 = vadd.f32 %v516_v17, %v508_v16 }
 0x717   :  { %2609 = vtanh.f32 %v2903_v18 }
 0x724   :  { %v2610_v19 = vpop.eup %2609 }
 0x725   :  { %521 = vrot.lane.b32.xlu1 %v2610_v19, %s2759_s0 }
 0x797   :  { %v522_v20 = vpop.permute.xlu1 %521 }
 0x798   :  { %v524_v21 = vmul.f32 %v2608_v12, %v522_v20 }
 0x79a   :  { %526 = vrot.lane.b32.xlu0 %v524_v21, %s2755_s1 }
 0x80c   :  { %v527_v22 = vpop.permute.xlu0 %526 }
 0x80d   :  { %2420 = vmatmul.mubr.msk.f32.vlgmr.msra.gmra.mxu1 %vm83_vm1, %v527_v22  ;;  %2431 = vmatmul.mubr.msk.f32.vlgmr.msra.gmra.mxu0 %vm83_vm1, %v527_v22 }
 0x80e   :  { %2434 = vmatpush3.msra.mxu1 %v2813_v6  ;;  %2435 = vmatprep.mubr.msk.f32.mxu1 %vm2758_vm0, %v2757_v0 }
 0x80f   :  { %2449 = vmatprep.subr.mxu1 %v2757_v0  ;;  %2439 = vmatpush3.msra.mxu0 %v2842_v28 }
 0x810   :  { %2440 = vmatprep.subr.mxu0 %v2757_v0  ;;  %2446 = vmatprep.mubr.msk.f32.mxu0 %vm2758_vm0, %v2757_v0 }
 0x811   :  { %2441 = vmatpush3.msra.mxu0 %v2844_v29 }
 0x812   :  { %2442 = vmatprep.subr.mxu0 %v2757_v0 }
 0x813   :  { %2443 = vmatpush3.msra.mxu0 %v2848_v30 }
 0x814   :  { %2444 = vmatprep.subr.mxu0 %v2757_v0 }
 0x815   :  { %2445 = vmatpush3.msra.mxu0 %v2852_v31 }
 0x816   :  { %2460 = vmatprep.subr.mxu0 %v2757_v0 }
 0x8cd   :  { %v596_v23 = vpop.f32.mrf.mxu1  ;;  %v692_v24 = vpop.f32.mrf.mxu0 }
 0x8ce   :  { %v597_v26 = vadd.f32 %v596_v23, %v2876_v37 }
 0x8cf   :  { %v2421_v27 = vpop.f32.mrf.mxu1  ;;  %v2432_v32 = vpop.f32.mrf.mxu0 }
 0x8d0   :  { %601 = vst.msk [vmem:[#allocation8 + $0x2] sm:$0x3] %vm331_vm2, %v597_v26  ;;  %v602_v33 = vadd.f32 %v597_v26, %v76_v25 }
 0x8d2   :  { %v603_v34 = vsel %vm331_vm2, %v602_v33, -inf }
 0x8d3   :  { %604 = vmax.xlane.f32.xlu1 %v603_v34 }
 0x95c   :  { %v605_v35 = vpop.xlane.xlu1 %604 }
 0x95d   :  { %vm606_vm7 = vcmp.ge.f32.partialorder %v602_v33, %v605_v35 }
 0x95e   :  { %v607_v36 = vsel %vm606_vm7, %v2882_v46, 8 }
 0x95f   :  { %v608_v38 = vsel %vm331_vm2, %v607_v36, 2147483647 }
 0x960   :  { %v610_v39 = vshra.s32 %v608_v38, 16  ;;  %v609_v41 = vand.u32 65535, %v608_v38 }
 0x962   :  { %v612_v40 = vcvt.s32.f32 %v610_v39  ;;  %v611_v43 = vcvt.s32.f32 %v609_v41 }
 0x964   :  { %613 = vmin.xlane.f32.xlu0 %v612_v40 }
 0x9ed   :  { %v614_v42 = vpop.xlane.xlu0 %613 }
 0x9ee   :  { %vm615_vm8 = vcmp.eq.f32.partialorder %v612_v40, %v614_v42  ;;  %v620_v45 = vcvt.f32.s32 %v614_v42 }
 0x9ef   :  { %v616_v44 = vsel %vm615_vm8, %v611_v43, inf }
 0x9f0   :  { %617 = vmin.xlane.f32.xlu0 %v616_v44  ;;  %v621_v48 = vshll.u32 %v620_v45, 16 }
 0xa79   :  { %v618_v47 = vpop.xlane.xlu0 %617 }
 0xa7a   :  { %v619_v49 = vcvt.f32.s32 %v618_v47 }
 0xa7c   :  { %v622_v50 = vadd.s32 %v621_v48, %v619_v49 }
 0xa7e   :  { %vm623_vm9 = vcmp.eq.s32.totalorder %v2882_v46, %v622_v50 }
 0xa7f   :  { %v2242_v51 = vsel %vm623_vm9, 1.0, %v2757_v0 }
 0xa80   :  { %2436 = vmatmul.mubr.msk.f32.vlgmr.msra.gmra.mxu1 %vm157_vm5, %v2242_v51 }
 0xa81   :  { %2450 = vmatpush3.msra.mxu1 %v2799_v1  ;;  %2457 = vmatprep.mubr.msk.f32.mxu1 %vm2758_vm0, %v2757_v0 }
 0xa82   :  { %2451 = vmatprep.subr.mxu1 %v2757_v0 }
 0xa83   :  { %2452 = vmatpush3.msra.mxu1 %v2801_v2 }
 0xa84   :  { %2453 = vmatprep.subr.mxu1 %v2757_v0 }
 0xa85   :  { %2454 = vmatpush3.msra.mxu1 %v2805_v3 }
 0xa86   :  { %2455 = vmatprep.subr.mxu1 %v2757_v0 }
 0xa87   :  { %2456 = vmatpush3.msra.mxu1 %v2809_v4 }
 0xa88   :  { %2465 = vmatprep.subr.mxu1 %v2757_v0 }
 0xb40   :  { %v765_v52 = vpop.f32.mrf.mxu1 }
 0xb41   :  { %v766_v53 = vadd.f32 %v765_v52, %v692_v24 }
 0xb42   :  { %v2437_v54 = vpop.f32.mrf.mxu1 }
 0xb43   :  { %v769_v55 = vadd.f32 %v766_v53, %v2834_v13 }
 0xb45   :  { %2611 = vtanh.f32 %v769_v55  ;;  %v2245_v57 = vmul.f32 -1.442695, %v769_v55 }
 0xb47   :  { %2613 = vpow2.f32 %v2245_v57 }
 0xb52   :  { %v2612_v56 = vpop.eup %2611 }
 0xb53   :  { %779 = vrot.lane.b32.xlu1 %v2612_v56, %s2759_s0 }
 0xb54   :  { %v2614_v58 = vpop.eup %2613 }
 0xb55   :  { %v773_v59 = vadd.f32 1.0, %v2614_v58 }
 0xb57   :  { %2615 = vrcp.f32 %v773_v59 }
 0xb64   :  { %v2616_v60 = vpop.eup %2615 }
 0xb65   :  { %v777_v63 = vmul.f32 %v2616_v60, %v2903_v18 }
 0xbc5   :  { %v780_v61 = vpop.permute.xlu1 %779 }
 0xbc6   :  { %v782_v62 = vmul.f32 %v2616_v60, %v780_v61 }
 0xbc8   :  { %784 = vrot.lane.b32.xlu0 %v782_v62, %s2755_s1  ;;  %v78_v62 = vld [vmem:[#allocation7 + $0x6] sm:$0x3] }
 0xc3a   :  { %v785_v5 = vpop.permute.xlu0 %784 }
 0xc3b   :  { %v2946_v7 = vadd.f32 %v785_v5, %v777_v63 }
 0xc3d   :  { %2617 = vtanh.f32 %v2946_v7 }
 0xc4a   :  { %v2618_v8 = vpop.eup %2617 }
 0xc4b   :  { %790 = vrot.lane.b32.xlu1 %v2618_v8, %s2759_s0 }
 0xcbd   :  { %v791_v9 = vpop.permute.xlu1 %790 }
 0xcbe   :  { %v793_v10 = vmul.f32 %v2616_v60, %v791_v9 }
 0xcc0   :  { %795 = vrot.lane.b32.xlu1 %v793_v10, %s2755_s1 }
 0xd32   :  { %v796_v11 = vpop.permute.xlu1 %795 }
 0xd33   :  { %2447 = vmatmul.mubr.msk.f32.vlgmr.msra.gmra.mxu0 %vm83_vm1, %v796_v11  ;;  %2458 = vmatmul.mubr.msk.f32.vlgmr.msra.gmra.mxu1 %vm83_vm1, %v796_v11 }
 0xd34   :  { %2461 = vmatpush3.msra.mxu0 %v2813_v6  ;;  %2462 = vmatprep.mubr.msk.f32.mxu0 %vm2758_vm0, %v2757_v0 }
 0xd35   :  { %2476 = vmatprep.subr.mxu0 %v2757_v0  ;;  %2466 = vmatpush3.msra.mxu1 %v2842_v28 }
 0xd36   :  { %2467 = vmatprep.subr.mxu1 %v2757_v0  ;;  %2473 = vmatprep.mubr.msk.f32.mxu1 %vm2758_vm0, %v2757_v0 }
 0xd37   :  { %2468 = vmatpush3.msra.mxu1 %v2844_v29 }
 0xd38   :  { %2469 = vmatprep.subr.mxu1 %v2757_v0 }
 0xd39   :  { %2470 = vmatpush3.msra.mxu1 %v2848_v30 }
 0xd3a   :  { %2471 = vmatprep.subr.mxu1 %v2757_v0 }
 0xd3b   :  { %2472 = vmatpush3.msra.mxu1 %v2852_v31 }
 0xd3c   :  { %2487 = vmatprep.subr.mxu1 %v2757_v0 }
 0xdf3   :  { %v865_v12 = vpop.f32.mrf.mxu0  ;;  %v961_v14 = vpop.f32.mrf.mxu1 }
 0xdf4   :  { %v866_v16 = vadd.f32 %v865_v12, %v2876_v37 }
 0xdf5   :  { %v2448_v17 = vpop.f32.mrf.mxu0  ;;  %v2459_v18 = vpop.f32.mrf.mxu1 }
 0xdf6   :  { %870 = vst.msk [vmem:[#allocation8 + $0x4] sm:$0x3] %vm331_vm2, %v866_v16  ;;  %v871_v19 = vadd.f32 %v866_v16, %v77_v15 }
 0xdf8   :  { %v872_v20 = vsel %vm331_vm2, %v871_v19, -inf }
 0xdf9   :  { %873 = vmax.xlane.f32.xlu0 %v872_v20 }
 0xe82   :  { %v874_v21 = vpop.xlane.xlu0 %873 }
 0xe83   :  { %vm875_vm10 = vcmp.ge.f32.partialorder %v871_v19, %v874_v21 }
 0xe84   :  { %v876_v22 = vsel %vm875_vm10, %v2882_v46, 8 }
 0xe85   :  { %v877_v23 = vsel %vm331_vm2, %v876_v22, 2147483647 }
 0xe86   :  { %v879_v24 = vshra.s32 %v877_v23, 16  ;;  %v878_v26 = vand.u32 65535, %v877_v23 }
 0xe88   :  { %v881_v25 = vcvt.s32.f32 %v879_v24  ;;  %v880_v32 = vcvt.s32.f32 %v878_v26 }
 0xe8a   :  { %882 = vmin.xlane.f32.xlu1 %v881_v25 }
 0xf13   :  { %v883_v27 = vpop.xlane.xlu1 %882 }
 0xf14   :  { %vm884_vm11 = vcmp.eq.f32.partialorder %v881_v25, %v883_v27  ;;  %v889_v34 = vcvt.f32.s32 %v883_v27 }
 0xf15   :  { %v885_v33 = vsel %vm884_vm11, %v880_v32, inf }
 0xf16   :  { %886 = vmin.xlane.f32.xlu0 %v885_v33  ;;  %v890_v36 = vshll.u32 %v889_v34, 16 }
 0xf9f   :  { %v887_v35 = vpop.xlane.xlu0 %886 }
 0xfa0   :  { %v888_v38 = vcvt.f32.s32 %v887_v35 }
 0xfa2   :  { %v891_v39 = vadd.s32 %v890_v36, %v888_v38 }
 0xfa4   :  { %vm892_vm12 = vcmp.eq.s32.totalorder %v2882_v46, %v891_v39 }
 0xfa5   :  { %v2247_v40 = vsel %vm892_vm12, 1.0, %v2757_v0 }
 0xfa6   :  { %2463 = vmatmul.mubr.msk.f32.vlgmr.msra.gmra.mxu0 %vm157_vm5, %v2247_v40 }
 0xfa7   :  { %2477 = vmatpush3.msra.mxu0 %v2799_v1  ;;  %2484 = vmatprep.mubr.msk.f32.mxu0 %vm2758_vm0, %v2757_v0 }
 0xfa8   :  { %2478 = vmatprep.subr.mxu0 %v2757_v0 }
 0xfa9   :  { %2479 = vmatpush3.msra.mxu0 %v2801_v2 }
 0xfaa   :  { %2480 = vmatprep.subr.mxu0 %v2757_v0 }
 0xfab   :  { %2481 = vmatpush3.msra.mxu0 %v2805_v3 }
 0xfac   :  { %2482 = vmatprep.subr.mxu0 %v2757_v0 }
 0xfad   :  { %2483 = vmatpush3.msra.mxu0 %v2809_v4 }
 0xfae   :  { %2492 = vmatprep.subr.mxu0 %v2757_v0 }
0x1066   :  { %v1034_v41 = vpop.f32.mrf.mxu0 }
0x1067   :  { %v1035_v42 = vadd.f32 %v1034_v41, %v961_v14 }
0x1068   :  { %v2464_v43 = vpop.f32.mrf.mxu0 }
0x1069   :  { %v1038_v44 = vadd.f32 %v1035_v42, %v2834_v13 }
0x106b   :  { %2619 = vtanh.f32 %v1038_v44  ;;  %v2250_v47 = vmul.f32 -1.442695, %v1038_v44 }
0x106d   :  { %2621 = vpow2.f32 %v2250_v47 }
0x1078   :  { %v2620_v45 = vpop.eup %2619 }
0x1079   :  { %1048 = vrot.lane.b32.xlu0 %v2620_v45, %s2759_s0 }
0x107a   :  { %v2622_v48 = vpop.eup %2621 }
0x107b   :  { %v1042_v49 = vadd.f32 1.0, %v2622_v48 }
0x107d   :  { %2623 = vrcp.f32 %v1042_v49 }
0x108a   :  { %v2624_v50 = vpop.eup %2623 }
0x108b   :  { %v1046_v53 = vmul.f32 %v2624_v50, %v2946_v7 }
0x10eb   :  { %v1049_v51 = vpop.permute.xlu0 %1048 }
0x10ec   :  { %v1051_v52 = vmul.f32 %v2624_v50, %v1049_v51 }
0x10ee   :  { %1053 = vrot.lane.b32.xlu1 %v1051_v52, %s2755_s1  ;;  %v79_v52 = vld [vmem:[#allocation7 + $0x8] sm:$0x3] }
0x1160   :  { %v1054_v54 = vpop.permute.xlu1 %1053 }
0x1161   :  { %v2989_v55 = vadd.f32 %v1054_v54, %v1046_v53 }
0x1163   :  { %2625 = vtanh.f32 %v2989_v55 }
0x1170   :  { %v2626_v56 = vpop.eup %2625 }
0x1171   :  { %1059 = vrot.lane.b32.xlu1 %v2626_v56, %s2759_s0 }
0x11e3   :  { %v1060_v57 = vpop.permute.xlu1 %1059 }
0x11e4   :  { %v1062_v58 = vmul.f32 %v2624_v50, %v1060_v57 }
0x11e6   :  { %1064 = vrot.lane.b32.xlu0 %v1062_v58, %s2755_s1 }
0x1258   :  { %v1065_v59 = vpop.permute.xlu0 %1064 }
0x1259   :  { %2474 = vmatmul.mubr.msk.f32.vlgmr.msra.gmra.mxu1 %vm83_vm1, %v1065_v59  ;;  %2485 = vmatmul.mubr.msk.f32.vlgmr.msra.gmra.mxu0 %vm83_vm1, %v1065_v59 }
0x125a   :  { %2488 = vmatpush3.msra.mxu1 %v2813_v6  ;;  %2489 = vmatprep.mubr.msk.f32.mxu1 %vm2758_vm0, %v2757_v0 }
0x125b   :  { %2503 = vmatprep.subr.mxu1 %v2757_v0  ;;  %2493 = vmatpush3.msra.mxu0 %v2842_v28 }
0x125c   :  { %2494 = vmatprep.subr.mxu0 %v2757_v0  ;;  %2500 = vmatprep.mubr.msk.f32.mxu0 %vm2758_vm0, %v2757_v0 }
0x125d   :  { %2495 = vmatpush3.msra.mxu0 %v2844_v29 }
0x125e   :  { %2496 = vmatprep.subr.mxu0 %v2757_v0 }
0x125f   :  { %2497 = vmatpush3.msra.mxu0 %v2848_v30 }
0x1260   :  { %2498 = vmatprep.subr.mxu0 %v2757_v0 }
0x1261   :  { %2499 = vmatpush3.msra.mxu0 %v2852_v31 }
0x1262   :  { %2514 = vmatprep.subr.mxu0 %v2757_v0 }
0x1319   :  { %v1134_v60 = vpop.f32.mrf.mxu1  ;;  %v1230_v61 = vpop.f32.mrf.mxu0 }
0x131a   :  { %v1135_v63 = vadd.f32 %v1134_v60, %v2876_v37 }
0x131b   :  { %v2475_v5 = vpop.f32.mrf.mxu1  ;;  %v2486_v7 = vpop.f32.mrf.mxu0 }
0x131c   :  { %1139 = vst.msk [vmem:[#allocation8 + $0x6] sm:$0x3] %vm331_vm2, %v1135_v63  ;;  %v1140_v8 = vadd.f32 %v1135_v63, %v78_v62 }
0x131e   :  { %v1141_v9 = vsel %vm331_vm2, %v1140_v8, -inf }
0x131f   :  { %1142 = vmax.xlane.f32.xlu1 %v1141_v9 }
0x13a8   :  { %v1143_v10 = vpop.xlane.xlu1 %1142 }
0x13a9   :  { %vm1144_vm13 = vcmp.ge.f32.partialorder %v1140_v8, %v1143_v10 }
0x13aa   :  { %v1145_v11 = vsel %vm1144_vm13, %v2882_v46, 8 }
0x13ab   :  { %v1146_v12 = vsel %vm331_vm2, %v1145_v11, 2147483647 }
0x13ac   :  { %v1148_v14 = vshra.s32 %v1146_v12, 16  ;;  %v1147_v16 = vand.u32 65535, %v1146_v12 }
0x13ae   :  { %v1150_v15 = vcvt.s32.f32 %v1148_v14  ;;  %v1149_v18 = vcvt.s32.f32 %v1147_v16 }
0x13b0   :  { %1151 = vmin.xlane.f32.xlu0 %v1150_v15 }
0x1439   :  { %v1152_v17 = vpop.xlane.xlu0 %1151 }
0x143a   :  { %vm1153_vm14 = vcmp.eq.f32.partialorder %v1150_v15, %v1152_v17  ;;  %v1158_v20 = vcvt.f32.s32 %v1152_v17 }
0x143b   :  { %v1154_v19 = vsel %vm1153_vm14, %v1149_v18, inf }
0x143c   :  { %1155 = vmin.xlane.f32.xlu0 %v1154_v19  ;;  %v1159_v22 = vshll.u32 %v1158_v20, 16 }
0x14c5   :  { %v1156_v21 = vpop.xlane.xlu0 %1155 }
0x14c6   :  { %v1157_v23 = vcvt.f32.s32 %v1156_v21 }
0x14c8   :  { %v1160_v24 = vadd.s32 %v1159_v22, %v1157_v23 }
0x14ca   :  { %vm1161_vm15 = vcmp.eq.s32.totalorder %v2882_v46, %v1160_v24 }
0x14cb   :  { %v2252_v25 = vsel %vm1161_vm15, 1.0, %v2757_v0 }
0x14cc   :  { %2490 = vmatmul.mubr.msk.f32.vlgmr.msra.gmra.mxu1 %vm157_vm5, %v2252_v25 }
0x14cd   :  { %2504 = vmatpush3.msra.mxu1 %v2799_v1  ;;  %2511 = vmatprep.mubr.msk.f32.mxu1 %vm2758_vm0, %v2757_v0 }
0x14ce   :  { %2505 = vmatprep.subr.mxu1 %v2757_v0 }
0x14cf   :  { %2506 = vmatpush3.msra.mxu1 %v2801_v2 }
0x14d0   :  { %2507 = vmatprep.subr.mxu1 %v2757_v0 }
0x14d1   :  { %2508 = vmatpush3.msra.mxu1 %v2805_v3 }
0x14d2   :  { %2509 = vmatprep.subr.mxu1 %v2757_v0 }
0x14d3   :  { %2510 = vmatpush3.msra.mxu1 %v2809_v4 }
0x14d4   :  { %2519 = vmatprep.subr.mxu1 %v2757_v0 }
0x158c   :  { %v1303_v26 = vpop.f32.mrf.mxu1 }
0x158d   :  { %v1304_v27 = vadd.f32 %v1303_v26, %v1230_v61 }
0x158e   :  { %v2491_v32 = vpop.f32.mrf.mxu1 }
0x158f   :  { %v1307_v33 = vadd.f32 %v1304_v27, %v2834_v13 }
0x1591   :  { %2627 = vtanh.f32 %v1307_v33  ;;  %v2255_v35 = vmul.f32 -1.442695, %v1307_v33 }
0x1593   :  { %2629 = vpow2.f32 %v2255_v35  ;;  %v80_v35 = vld [vmem:[#allocation7 + $0xa] sm:$0x3] }
0x159e   :  { %v2628_v34 = vpop.eup %2627 }
0x159f   :  { %1317 = vrot.lane.b32.xlu1 %v2628_v34, %s2759_s0 }
0x15a0   :  { %v2630_v36 = vpop.eup %2629 }
0x15a1   :  { %v1311_v38 = vadd.f32 1.0, %v2630_v36 }
0x15a3   :  { %2631 = vrcp.f32 %v1311_v38 }
0x15b0   :  { %v2632_v39 = vpop.eup %2631 }
0x15b1   :  { %v1315_v42 = vmul.f32 %v2632_v39, %v2989_v55 }
0x1611   :  { %v1318_v40 = vpop.permute.xlu1 %1317 }
0x1612   :  { %v1320_v41 = vmul.f32 %v2632_v39, %v1318_v40 }
0x1614   :  { %1322 = vrot.lane.b32.xlu0 %v1320_v41, %s2755_s1 }
0x1686   :  { %v1323_v43 = vpop.permute.xlu0 %1322 }
0x1687   :  { %v3032_v44 = vadd.f32 %v1323_v43, %v1315_v42 }
0x1689   :  { %2633 = vtanh.f32 %v3032_v44 }
0x1696   :  { %v2634_v45 = vpop.eup %2633 }
0x1697   :  { %1328 = vrot.lane.b32.xlu1 %v2634_v45, %s2759_s0 }
0x1709   :  { %v1329_v47 = vpop.permute.xlu1 %1328 }
0x170a   :  { %v1331_v48 = vmul.f32 %v2632_v39, %v1329_v47 }
0x170c   :  { %1333 = vrot.lane.b32.xlu1 %v1331_v48, %s2755_s1 }
0x177e   :  { %v1334_v49 = vpop.permute.xlu1 %1333 }
0x177f   :  { %2501 = vmatmul.mubr.msk.f32.vlgmr.msra.gmra.mxu0 %vm83_vm1, %v1334_v49  ;;  %2512 = vmatmul.mubr.msk.f32.vlgmr.msra.gmra.mxu1 %vm83_vm1, %v1334_v49 }
0x1780   :  { %2515 = vmatpush3.msra.mxu0 %v2813_v6  ;;  %2516 = vmatprep.mubr.msk.f32.mxu0 %vm2758_vm0, %v2757_v0 }
0x1781   :  { %2530 = vmatprep.subr.mxu0 %v2757_v0  ;;  %2520 = vmatpush3.msra.mxu1 %v2842_v28 }
0x1782   :  { %2521 = vmatprep.subr.mxu1 %v2757_v0  ;;  %2527 = vmatprep.mubr.msk.f32.mxu1 %vm2758_vm0, %v2757_v0 }
0x1783   :  { %2522 = vmatpush3.msra.mxu1 %v2844_v29 }
0x1784   :  { %2523 = vmatprep.subr.mxu1 %v2757_v0 }
0x1785   :  { %2524 = vmatpush3.msra.mxu1 %v2848_v30 }
0x1786   :  { %2525 = vmatprep.subr.mxu1 %v2757_v0 }
0x1787   :  { %2526 = vmatpush3.msra.mxu1 %v2852_v31 }
0x1788   :  { %2541 = vmatprep.subr.mxu1 %v2757_v0 }
0x183f   :  { %v1403_v50 = vpop.f32.mrf.mxu0  ;;  %v1499_v51 = vpop.f32.mrf.mxu1 }
0x1840   :  { %v1404_v53 = vadd.f32 %v1403_v50, %v2876_v37 }
0x1841   :  { %v2502_v54 = vpop.f32.mrf.mxu0  ;;  %v2513_v55 = vpop.f32.mrf.mxu1 }
0x1842   :  { %1408 = vst.msk [vmem:[#allocation8 + $0x8] sm:$0x3] %vm331_vm2, %v1404_v53  ;;  %v1409_v56 = vadd.f32 %v1404_v53, %v79_v52 }
0x1844   :  { %v1410_v57 = vsel %vm331_vm2, %v1409_v56, -inf }
0x1845   :  { %1411 = vmax.xlane.f32.xlu0 %v1410_v57 }
0x18ce   :  { %v1412_v58 = vpop.xlane.xlu0 %1411 }
0x18cf   :  { %vm1413_vm3 = vcmp.ge.f32.partialorder %v1409_v56, %v1412_v58  ;;  %v2659_v58 = vld [vmem:[#allocation5 + $0x20] sm:$0xff] }
0x18d0   :  { %v1414_v59 = vsel %vm1413_vm3, %v2882_v46, 8 }
0x18d1   :  { %v1415_v60 = vsel %vm331_vm2, %v1414_v59, 2147483647  ;;  %v2660_v59 = vld [vmem:[#allocation5 + $0x18] sm:$0xff] }
0x18d2   :  { %v1417_v61 = vshra.s32 %v1415_v60, 16  ;;  %v1416_v63 = vand.u32 65535, %v1415_v60  ;;  %v2661_v60 = vld [vmem:[#allocation5 + $0x10] sm:$0xff] }
0x18d4   :  { %v1419_v62 = vcvt.s32.f32 %v1417_v61  ;;  %v1418_v7 = vcvt.s32.f32 %v1416_v63  ;;  %v2662_v61 = vld [vmem:[#allocation5 + $0x8] sm:$0xff] }
0x18d6   :  { %1420 = vmin.xlane.f32.xlu1 %v1419_v62 }
0x195f   :  { %v1421_v5 = vpop.xlane.xlu1 %1420 }
0x1960   :  { %vm1422_vm4 = vcmp.eq.f32.partialorder %v1419_v62, %v1421_v5  ;;  %v1427_v9 = vcvt.f32.s32 %v1421_v5 }
0x1961   :  { %v1423_v8 = vsel %vm1422_vm4, %v1418_v7, inf }
0x1962   :  { %1424 = vmin.xlane.f32.xlu0 %v1423_v8  ;;  %v1428_v11 = vshll.u32 %v1427_v9, 16 }
0x19eb   :  { %v1425_v10 = vpop.xlane.xlu0 %1424 }
0x19ec   :  { %v1426_v12 = vcvt.f32.s32 %v1425_v10 }
0x19ee   :  { %v1429_v14 = vadd.s32 %v1428_v11, %v1426_v12 }
0x19f0   :  { %vm1430_vm6 = vcmp.eq.s32.totalorder %v2882_v46, %v1429_v14 }
0x19f1   :  { %v2257_v15 = vsel %vm1430_vm6, 1.0, %v2757_v0 }
0x19f2   :  { %2517 = vmatmul.mubr.msk.f32.vlgmr.msra.gmra.mxu0 %vm157_vm5, %v2257_v15 }
0x19f3   :  { %2531 = vmatpush3.msra.mxu0 %v2799_v1  ;;  %2538 = vmatprep.mubr.msk.f32.mxu0 %vm2758_vm0, %v2757_v0 }
0x19f4   :  { %2532 = vmatprep.subr.mxu0 %v2757_v0 }
0x19f5   :  { %2533 = vmatpush3.msra.mxu0 %v2801_v2 }
0x19f6   :  { %2534 = vmatprep.subr.mxu0 %v2757_v0 }
0x19f7   :  { %2535 = vmatpush3.msra.mxu0 %v2805_v3 }
0x19f8   :  { %2536 = vmatprep.subr.mxu0 %v2757_v0 }
0x19f9   :  { %2537 = vmatpush3.msra.mxu0 %v2809_v4 }
0x19fa   :  { %2546 = vmatprep.subr.mxu0 %v2757_v0 }
0x1ab2   :  { %v1572_v16 = vpop.f32.mrf.mxu0 }
0x1ab3   :  { %v1573_v17 = vadd.f32 %v1572_v16, %v1499_v51 }
0x1ab4   :  { %v2518_v1 = vpop.f32.mrf.mxu0 }
0x1ab5   :  { %v1576_v18 = vadd.f32 %v1573_v17, %v2834_v13 }
0x1ab7   :  { %2635 = vtanh.f32 %v1576_v18  ;;  %v2260_v2 = vmul.f32 -1.442695, %v1576_v18 }
0x1ab9   :  { %2637 = vpow2.f32 %v2260_v2 }
0x1ac4   :  { %v2636_v19 = vpop.eup %2635 }
0x1ac5   :  { %1586 = vrot.lane.b32.xlu0 %v2636_v19, %s2759_s0 }
0x1ac6   :  { %v2638_v20 = vpop.eup %2637 }
0x1ac7   :  { %v1580_v21 = vadd.f32 1.0, %v2638_v20 }
0x1ac9   :  { %2639 = vrcp.f32 %v1580_v21  ;;  %v2663_v21 = vld [vmem:[#allocation5] sm:$0xff] }
0x1ad6   :  { %v2640_v3 = vpop.eup %2639 }
0x1ad7   :  { %v1584_v4 = vmul.f32 %v2640_v3, %v3032_v44 }
0x1b37   :  { %v1587_v22 = vpop.permute.xlu0 %1586 }
0x1b38   :  { %v1589_v23 = vmul.f32 %v2640_v3, %v1587_v22 }
0x1b3a   :  { %1591 = vrot.lane.b32.xlu1 %v1589_v23, %s2755_s1  ;;  %v81_v23 = vld [vmem:[#allocation7 + $0xc] sm:$0x3] }
0x1bac   :  { %v1592_v24 = vpop.permute.xlu1 %1591 }
0x1bad   :  { %v3075_v25 = vadd.f32 %v1592_v24, %v1584_v4 }
0x1baf   :  { %2641 = vtanh.f32 %v3075_v25 }
0x1bbc   :  { %v2642_v26 = vpop.eup %2641 }
0x1bbd   :  { %1597 = vrot.lane.b32.xlu1 %v2642_v26, %s2759_s0 }
0x1c2f   :  { %v1598_v27 = vpop.permute.xlu1 %1597 }
0x1c30   :  { %v1600_v32 = vmul.f32 %v2640_v3, %v1598_v27 }
0x1c32   :  { %1602 = vrot.lane.b32.xlu0 %v1600_v32, %s2755_s1 }
0x1ca4   :  { %v1603_v33 = vpop.permute.xlu0 %1602 }
0x1ca5   :  { %2528 = vmatmul.mubr.msk.f32.vlgmr.msra.gmra.mxu1 %vm83_vm1, %v1603_v33  ;;  %2539 = vmatmul.mubr.msk.f32.vlgmr.msra.gmra.mxu0 %vm83_vm1, %v1603_v33 }
0x1ca6   :  { %2542 = vmatpush3.msra.mxu1 %v2813_v6  ;;  %2543 = vmatprep.mubr.msk.f32.mxu1 %vm2758_vm0, %v2757_v0 }
0x1ca7   :  { %2557 = vmatprep.subr.mxu1 %v2757_v0  ;;  %2547 = vmatpush3.msra.mxu0 %v2842_v28 }
0x1ca8   :  { %2548 = vmatprep.subr.mxu0 %v2757_v0  ;;  %2554 = vmatprep.mubr.msk.f32.mxu0 %vm2758_vm0, %v2757_v0 }
0x1ca9   :  { %2549 = vmatpush3.msra.mxu0 %v2844_v29 }
0x1caa   :  { %2550 = vmatprep.subr.mxu0 %v2757_v0 }
0x1cab   :  { %2551 = vmatpush3.msra.mxu0 %v2848_v30 }
0x1cac   :  { %2552 = vmatprep.subr.mxu0 %v2757_v0 }
0x1cad   :  { %2553 = vmatpush3.msra.mxu0 %v2852_v31 }
0x1cae   :  { %2568 = vmatprep.subr.mxu0 %v2757_v0 }
0x1d65   :  { %v1672_v6 = vpop.f32.mrf.mxu1  ;;  %v1768_v34 = vpop.f32.mrf.mxu0 }
0x1d66   :  { %v1673_v36 = vadd.f32 %v1672_v6, %v2876_v37 }
0x1d67   :  { %v2529_v38 = vpop.f32.mrf.mxu1  ;;  %v2540_v39 = vpop.f32.mrf.mxu0 }
0x1d68   :  { %1677 = vst.msk [vmem:[#allocation8 + $0xa] sm:$0x3] %vm331_vm2, %v1673_v36  ;;  %v1678_v40 = vadd.f32 %v1673_v36, %v80_v35 }
0x1d6a   :  { %v1679_v41 = vsel %vm331_vm2, %v1678_v40, -inf }
0x1d6b   :  { %1680 = vmax.xlane.f32.xlu1 %v1679_v41 }
0x1df4   :  { %v1681_v42 = vpop.xlane.xlu1 %1680 }
0x1df5   :  { %vm1682_vm7 = vcmp.ge.f32.partialorder %v1678_v40, %v1681_v42 }
0x1df6   :  { %v1683_v43 = vsel %vm1682_vm7, %v2882_v46, 8 }
0x1df7   :  { %v1684_v44 = vsel %vm331_vm2, %v1683_v43, 2147483647 }
0x1df8   :  { %v1686_v45 = vshra.s32 %v1684_v44, 16  ;;  %v1685_v48 = vand.u32 65535, %v1684_v44 }
0x1dfa   :  { %v1688_v47 = vcvt.s32.f32 %v1686_v45  ;;  %v1687_v50 = vcvt.s32.f32 %v1685_v48 }
0x1dfc   :  { %1689 = vmin.xlane.f32.xlu0 %v1688_v47 }
0x1e85   :  { %v1690_v49 = vpop.xlane.xlu0 %1689 }
0x1e86   :  { %vm1691_vm8 = vcmp.eq.f32.partialorder %v1688_v47, %v1690_v49  ;;  %v1696_v52 = vcvt.f32.s32 %v1690_v49 }
0x1e87   :  { %v1692_v51 = vsel %vm1691_vm8, %v1687_v50, inf }
0x1e88   :  { %1693 = vmin.xlane.f32.xlu0 %v1692_v51  ;;  %v1697_v54 = vshll.u32 %v1696_v52, 16 }
0x1f11   :  { %v1694_v53 = vpop.xlane.xlu0 %1693 }
0x1f12   :  { %v1695_v55 = vcvt.f32.s32 %v1694_v53 }
0x1f14   :  { %v1698_v56 = vadd.s32 %v1697_v54, %v1695_v55 }
0x1f16   :  { %vm1699_vm9 = vcmp.eq.s32.totalorder %v2882_v46, %v1698_v56 }
0x1f17   :  { %v2262_v57 = vsel %vm1699_vm9, 1.0, %v2757_v0 }
0x1f18   :  { %2544 = vmatmul.mubr.msk.f32.vlgmr.msra.gmra.mxu1 %vm157_vm5, %v2262_v57 }
0x1f19   :  { %2558 = vmatpush3.msra.mxu1 %v2659_v58  ;;  %2565 = vmatprep.mubr.msk.f32.mxu1 %vm2758_vm0, %v2757_v0 }
0x1f1a   :  { %2559 = vmatprep.subr.mxu1 %v2757_v0 }
0x1f1b   :  { %2560 = vmatpush3.msra.mxu1 %v2660_v59 }
0x1f1c   :  { %2561 = vmatprep.subr.mxu1 %v2757_v0 }
0x1f1d   :  { %2562 = vmatpush3.msra.mxu1 %v2661_v60 }
0x1f1e   :  { %2563 = vmatprep.subr.mxu1 %v2757_v0 }
0x1f1f   :  { %2564 = vmatpush3.msra.mxu1 %v2662_v61 }
0x1f20   :  { %2573 = vmatprep.subr.mxu1 %v2757_v0 }
0x1fd8   :  { %v1841_v62 = vpop.f32.mrf.mxu1 }
0x1fd9   :  { %v1842_v63 = vadd.f32 %v1841_v62, %v1768_v34 }
0x1fda   :  { %v2545_v5 = vpop.f32.mrf.mxu1 }
0x1fdb   :  { %v1845_v7 = vadd.f32 %v1842_v63, %v2834_v13 }
0x1fdd   :  { %2643 = vtanh.f32 %v1845_v7  ;;  %v2265_v9 = vmul.f32 -1.442695, %v1845_v7 }
0x1fdf   :  { %2645 = vpow2.f32 %v2265_v9 }
0x1fea   :  { %v2644_v8 = vpop.eup %2643 }
0x1feb   :  { %1855 = vrot.lane.b32.xlu1 %v2644_v8, %s2759_s0 }
0x1fec   :  { %v2646_v10 = vpop.eup %2645 }
0x1fed   :  { %v1849_v11 = vadd.f32 1.0, %v2646_v10 }
0x1fef   :  { %2647 = vrcp.f32 %v1849_v11 }
0x1ffc   :  { %v2648_v12 = vpop.eup %2647 }
0x1ffd   :  { %v1853_v16 = vmul.f32 %v2648_v12, %v3075_v25 }
0x205d   :  { %v1856_v14 = vpop.permute.xlu1 %1855 }
0x205e   :  { %v1858_v15 = vmul.f32 %v2648_v12, %v1856_v14 }
0x2060   :  { %1860 = vrot.lane.b32.xlu0 %v1858_v15, %s2755_s1 }
0x20d2   :  { %v1861_v17 = vpop.permute.xlu0 %1860 }
0x20d3   :  { %v3114_v1 = vadd.f32 %v1861_v17, %v1853_v16 }
0x20d5   :  { %2649 = vtanh.f32 %v3114_v1 }
0x20e2   :  { %v2650_v18 = vpop.eup %2649 }
0x20e3   :  { %1866 = vrot.lane.b32.xlu1 %v2650_v18, %s2759_s0 }
0x2155   :  { %v1867_v19 = vpop.permute.xlu1 %1866 }
0x2156   :  { %v1869_v2 = vmul.f32 %v2648_v12, %v1867_v19 }
0x2158   :  { %1871 = vrot.lane.b32.xlu1 %v1869_v2, %s2755_s1 }
0x21ca   :  { %v1872_v20 = vpop.permute.xlu1 %1871 }
0x21cb   :  { %2555 = vmatmul.mubr.msk.f32.vlgmr.msra.gmra.mxu0 %vm83_vm1, %v1872_v20  ;;  %2566 = vmatmul.mubr.msk.f32.vlgmr.msra.gmra.mxu1 %vm83_vm1, %v1872_v20 }
0x21cc   :  { %2569 = vmatpush3.msra.mxu0 %v2663_v21  ;;  %2570 = vmatprep.mubr.msk.f32.mxu0 %vm2758_vm0, %v2757_v0 }
0x21cd   :  { %2574 = vmatpush3.msra.mxu1 %v2842_v28  ;;  %2581 = vmatprep.mubr.msk.f32.mxu1 %vm2758_vm0, %v2757_v0 }
0x21ce   :  { %2575 = vmatprep.subr.mxu1 %v2757_v0 }
0x21cf   :  { %2576 = vmatpush3.msra.mxu1 %v2844_v29 }
0x21d0   :  { %2577 = vmatprep.subr.mxu1 %v2757_v0 }
0x21d1   :  { %2578 = vmatpush3.msra.mxu1 %v2848_v30 }
0x21d2   :  { %2579 = vmatprep.subr.mxu1 %v2757_v0 }
0x21d3   :  { %2580 = vmatpush3.msra.mxu1 %v2852_v31 }
0x228b   :  { %v1941_v3 = vpop.f32.mrf.mxu0  ;;  %v2037_v22 = vpop.f32.mrf.mxu1 }
0x228c   :  { %v1942_v28 = vadd.f32 %v1941_v3, %v2876_v37 }
0x228d   :  { %v2556_v4 = vpop.f32.mrf.mxu0  ;;  %v2567_v24 = vpop.f32.mrf.mxu1 }
0x228e   :  { %1946 = vst.msk [vmem:[#allocation8 + $0xc] sm:$0x3] %vm331_vm2, %v1942_v28  ;;  %v1947_v25 = vadd.f32 %v1942_v28, %v81_v23 }
0x2290   :  { %v1948_v29 = vsel %vm331_vm2, %v1947_v25, -inf }
0x2291   :  { %1949 = vmax.xlane.f32.xlu0 %v1948_v29 }
0x231a   :  { %v1950_v26 = vpop.xlane.xlu0 %1949 }
0x231b   :  { %vm1951_vm0 = vcmp.ge.f32.partialorder %v1947_v25, %v1950_v26 }
0x231c   :  { %v1952_v30 = vsel %vm1951_vm0, %v2882_v46, 8 }
0x231d   :  { %v1953_v27 = vsel %vm331_vm2, %v1952_v30, 2147483647 }
0x231e   :  { %v1955_v31 = vshra.s32 %v1953_v27, 16  ;;  %v1954_v33 = vand.u32 65535, %v1953_v27 }
0x2320   :  { %v1957_v32 = vcvt.s32.f32 %v1955_v31  ;;  %v1956_v34 = vcvt.s32.f32 %v1954_v33 }
0x2322   :  { %1958 = vmin.xlane.f32.xlu1 %v1957_v32 }
0x23ab   :  { %v1959_v6 = vpop.xlane.xlu1 %1958 }
0x23ac   :  { %vm1960_vm10 = vcmp.eq.f32.partialorder %v1957_v32, %v1959_v6  ;;  %v1965_v36 = vcvt.f32.s32 %v1959_v6 }
0x23ad   :  { %v1961_v35 = vsel %vm1960_vm10, %v1956_v34, inf }
0x23ae   :  { %1962 = vmin.xlane.f32.xlu0 %v1961_v35  ;;  %v1966_v39 = vshll.u32 %v1965_v36, 16 }
0x2437   :  { %v1963_v38 = vpop.xlane.xlu0 %1962 }
0x2438   :  { %v1964_v40 = vcvt.f32.s32 %v1963_v38 }
0x243a   :  { %v1967_v41 = vadd.s32 %v1966_v39, %v1964_v40 }
0x243c   :  { %vm1968_vm11 = vcmp.eq.s32.totalorder %v2882_v46, %v1967_v41 }
0x243d   :  { %v2267_v42 = vsel %vm1968_vm11, 1.0, %v2757_v0 }
0x243e   :  { %2571 = vmatmul.mubr.msk.f32.vlgmr.msra.gmra.mxu0 %vm157_vm5, %v2267_v42 }
0x24fe   :  { %v2110_v43 = vpop.f32.mrf.mxu0 }
0x24ff   :  { %v2111_v44 = vadd.f32 %v2110_v43, %v2037_v22 }
0x2500   :  { %v2572_v45 = vpop.f32.mrf.mxu0 }
0x2501   :  { %v2114_v47 = vadd.f32 %v2111_v44, %v2834_v13 }
0x2503   :  { %2651 = vtanh.f32 %v2114_v47  ;;  %v2270_v49 = vmul.f32 -1.442695, %v2114_v47 }
0x2505   :  { %2653 = vpow2.f32 %v2270_v49 }
0x2510   :  { %v2652_v48 = vpop.eup %2651 }
0x2511   :  { %2124 = vrot.lane.b32.xlu0 %v2652_v48, %s2759_s0 }
0x2512   :  { %v2654_v50 = vpop.eup %2653 }
0x2513   :  { %v2118_v51 = vadd.f32 1.0, %v2654_v50 }
0x2515   :  { %2655 = vrcp.f32 %v2118_v51 }
0x2522   :  { %v2656_v52 = vpop.eup %2655 }
0x2523   :  { %v2122_v0 = vmul.f32 %v2656_v52, %v3114_v1 }
0x2583   :  { %v2125_v46 = vpop.permute.xlu0 %2124 }
0x2584   :  { %v2127_v53 = vmul.f32 %v2656_v52, %v2125_v46 }
0x2586   :  { %2129 = vrot.lane.b32.xlu1 %v2127_v53, %s2755_s1 }
0x25f8   :  { %v2130_v54 = vpop.permute.xlu1 %2129 }
0x25f9   :  { %v2132_v55 = vadd.f32 %v2130_v54, %v2122_v0 }
0x25fb   :  { %2657 = vtanh.f32 %v2132_v55 }
0x2608   :  { %v2658_v13 = vpop.eup %2657 }
0x2609   :  { %2135 = vrot.lane.b32.xlu1 %v2658_v13, %s2759_s0 }
0x267b   :  { %v2136_v56 = vpop.permute.xlu1 %2135 }
0x267c   :  { %v2138_v57 = vmul.f32 %v2656_v52, %v2136_v56 }
0x267e   :  { %2140 = vrot.lane.b32.xlu0 %v2138_v57, %s2755_s1 }
0x26f0   :  { %v2141_v58 = vpop.permute.xlu0 %2140 }
0x26f1   :  { %2582 = vmatmul.mubr.msk.f32.vlgmr.msra.gmra.mxu1 %vm83_vm1, %v2141_v58 }
0x27b1   :  { %v2210_v59 = vpop.f32.mrf.mxu1 }
0x27b2   :  { %v2211_v60 = vadd.f32 %v2210_v59, %v2876_v37 }
0x27b3   :  { %v2583_v61 = vpop.f32.mrf.mxu1 }
0x27b4   :  { %2215 = vst.msk [vmem:[#allocation8 + $0xe] sm:$0x3] %vm331_vm2, %v2211_v60 }
0x27b5   :  { %2735 = shalt.err (!%p2732_p5)
}
0x27b6   :  { %2227 = dma.vmem_to_hbm [thread:$0]  %s2222_s30, 256, %s3158_s3, [#allocation4], %s2755_s1, %s2755_s1, %s2756_s27  }
0x27b7   :  { %2748 = dma.done.wait [#allocation4], 256  }
0x27b8   :  { %2749 = vsyncadd [#allocation4], 4294967040 }
0x27b9   :  { %2231 = vsyncpa [#allocation3], 1 }
0x27ba   :  { %2232 = vsyncpa [#allocation6], 1 }
0x27bb   :  { %2233 = vsyncpa [#allocation4], 1 }

</bundles_post_ra>
